<compile_context>
chip_gen: v5e
topology: v5e:2x2
jax: 0.10.0
libtpu: 0.0.40
codegen_flags: <defaults>
</compile_context>

<pallas_src>
import functools

import jax
import jax.numpy as jnp
from jax import lax
from jax.experimental import pallas as pl
from jax.experimental.pallas import tpu as pltpu

# ---- Configuration (mirrors FBPINN_Cos_nD.__init__ arguments) ----
DOMAIN = (0.0, 1.0)
N_SUBDOMAINS = 4
OVERLAP = 0.1
SIGMA = 0.02
N_HIDDEN_LAYERS = 2          # must be >= 2 so the hidden stack is non-empty
NEURONS = 32
N_MULTI_SCALE = 2
W_LIST = (1.0, 15.0)         # only used by loss/exact solution, not by forward

WIDTH = (DOMAIN[1] - DOMAIN[0]) / N_SUBDOMAINS
HT = N_SUBDOMAINS * NEURONS  # packed hidden width (4*32 = 128 -> MXU native)


def fbpinn_kernel(scalars_ref, a_ref, b_ref, w0_ref, b0_ref,
                  wh_ref, bh_ref, wo_ref, bo_ref, x_ref, out_ref):
    # SMEM scalars: [xn_scale, xn_offset, inv_sigma]
    xn_scale = scalars_ref[0]
    xn_offset = scalars_ref[1]
    inv_sigma = scalars_ref[2]

    x = x_ref[...]                           # (1, TILE) — points on the lane axis
    xn = x * xn_scale + xn_offset            # batch-global [-1, 1] normalization

    # ---- fused per-subdomain MLPs (hidden units on sublanes, batch on lanes) ----
    # Linear(1, H) for all subdomains: fan_in == 1 -> broadcast multiply; stays f32.
    h = jnp.tanh(w0_ref[...] * xn + b0_ref[...])                      # (HT, TILE) f32
    for l in range(N_HIDDEN_LAYERS - 1):                              # static unroll
        # Hidden matmul in the packed-weight dtype (f32 or bf16); f32 accumulation.
        z = jnp.dot(wh_ref[l], h.astype(wh_ref.dtype),
                    preferred_element_type=jnp.float32) + bh_ref[l]
        h = jnp.tanh(z)                                               # f32 tanh (portable)
    # Linear(H, 1) for all subdomains at once: (S, HT) @ (HT, TILE) on the MXU.
    # wo/bo already include the x N_MULTI_SCALE unnormalization fold.
    u = jnp.dot(wo_ref[...], h,
                preferred_element_type=jnp.float32) + bo_ref[...]     # (S, TILE)

    # ---- window functions, all subdomains vectorized over sublanes ----
    a_v = a_ref[...]                                                  # (S, 1)
    b_v = b_ref[...]                                                  # (S, 1)
    left = jax.nn.sigmoid((b_v - x) * inv_sigma)                      # (S, TILE)
    right = jax.nn.sigmoid((x - a_v) * inv_sigma)                     # (S, TILE)
    idx = lax.broadcasted_iota(jnp.int32, (N_SUBDOMAINS, 1), 0)
    win = jnp.where(idx == 0, left,
                    jnp.where(idx == N_SUBDOMAINS - 1, right, left * right))

    # Sum over subdomains, single lane-dense unmasked store.
    out_ref[...] = jnp.sum(win * u, axis=0, keepdims=True).astype(out_ref.dtype)


def _pack_params(params, hidden_dtype):
    """Pack per-subdomain MLPs into one block-diagonal 128-wide network."""
    S, H, L = N_SUBDOMAINS, NEURONS, N_HIDDEN_LAYERS
    eye = jnp.eye(S, dtype=jnp.float32)
    w0p = params["w0"].reshape(S * H, 1)                              # (HT, 1)
    b0p = params["b0"].reshape(S * H, 1)                              # (HT, 1)
    wh = jnp.transpose(params["wh"], (1, 0, 2, 3))                    # (L-1, S, H, H)
    # block (s, s) of whp[l] is Wh[s, l]^T  (so h_next = whp[l] @ h).
    whp = jnp.einsum("st,lsji->lsitj", eye, wh).reshape(L - 1, S * H, S * H)
    whp = whp.astype(hidden_dtype)                                    # bf16 path: MXU-native
    bhp = jnp.transpose(params["bh"], (1, 0, 2, 3)).reshape(L - 1, S * H, 1)
    # Fold the unnormalize_output (* n_multi_scale) into the output layer (exact x2).
    wop = (jnp.einsum("st,sh->sth", eye, params["wo"].reshape(S, H))
           .reshape(S, S * H)) * jnp.float32(N_MULTI_SCALE)           # (S, HT)
    bop = params["bo"].reshape(S, 1) * jnp.float32(N_MULTI_SCALE)     # (S, 1)
    a_v = params["a"].reshape(S, 1)
    b_v = params["b"].reshape(S, 1)
    return w0p, b0p, whp, bhp, wop, bop, a_v, b_v


def _choose_tile_lanes(n_points, *, cap=8192):
    """Lane-dense tile size: as large as possible up to `cap`, but aim for >= 2
    grid steps so the "parallel" grid axis shards across both v7x TensorCores."""
    per_core = -(-n_points // 2)              # ceil(N / 2)
    tile = -(-per_core // 128) * 128          # round up to a multiple of 128 lanes
    return int(max(128, min(cap, tile)))


@functools.partial(jax.jit, static_argnames=("tile_lanes", "hidden_dtype"))
def fbpinn_forward(x, params, *, tile_lanes=None, hidden_dtype=jnp.float32):
    """x: (N, 1) float32. Returns (N, 1) float32.

    tile_lanes: lane-dense batch tile (multiple of 128); None -> auto-chosen
    (min(8192, round_up(ceil(N/2), 128))) so big batches amortize per-step
    overhead while small batches still get >= 2 grid steps when possible.
    hidden_dtype: jnp.float32 or jnp.bfloat16 operand dtype for the hidden
    matmuls (f32 accumulation either way).
    """
    N = x.shape[0]
    if tile_lanes is None:
        tile_lanes = _choose_tile_lanes(N)
    assert tile_lanes % 128 == 0, "tile_lanes must be a multiple of 128"

    xf = x.reshape(-1).astype(jnp.float32)

    # normalize_input uses the batch-global min/max (matches the PyTorch module);
    # guard the degenerate x_max == x_min case against inf/NaN scales.
    x_min, x_max = jnp.min(xf), jnp.max(xf)
    inv_range = 1.0 / jnp.maximum(x_max - x_min, jnp.float32(1e-12))
    scalars = jnp.stack([2.0 * inv_range,                   # xn scale
                         -2.0 * x_min * inv_range - 1.0,    # xn offset
                         1.0 / params["sigma"][0]]          # 1/sigma
                        ).astype(jnp.float32)

    w0p, b0p, whp, bhp, wop, bop, a_v, b_v = _pack_params(params, hidden_dtype)

    # Pad the batch to a multiple of tile_lanes; padded lanes are computed but
    # discarded (each output lane depends only on its own x, so this is safe).
    n_tiles = (N + tile_lanes - 1) // tile_lanes
    Np = n_tiles * tile_lanes
    x_row = jnp.zeros((1, Np), jnp.float32).at[0, :N].set(xf)

    S, Lm1 = N_SUBDOMAINS, N_HIDDEN_LAYERS - 1

    def full(shape):
        # Resident (constant) weight block: same block index every grid step.
        # TODO(synk): pipeline_mode=pl.Buffered(1) would drop the ~70 KB double
        # buffer for these constants; skipped to keep lowering maximally portable.
        return pl.BlockSpec(shape, lambda i, _s=shape: (0,) * len(_s))

    out = pl.pallas_call(
        fbpinn_kernel,
        out_shape=jax.ShapeDtypeStruct((1, Np), jnp.float32),
        grid=(n_tiles,),
        in_specs=[
            pl.BlockSpec(memory_space=pltpu.MemorySpace.SMEM),   # scalars (3,)
            full((S, 1)),                                        # a
            full((S, 1)),                                        # b
            full((HT, 1)),                                       # w0 packed
            full((HT, 1)),                                       # b0 packed
            full((Lm1, HT, HT)),                                 # Wh^T block-diag
            full((Lm1, HT, 1)),                                  # bh packed
            full((S, HT)),                                       # wo packed (x n_multi_scale)
            full((S, 1)),                                        # bo (x n_multi_scale)
            pl.BlockSpec((1, tile_lanes), lambda i: (0, i)),     # x (lane-dense)
        ],
        out_specs=pl.BlockSpec((1, tile_lanes), lambda i: (0, i)),
        compiler_params=pltpu.CompilerParams(
            dimension_semantics=("parallel",),
            vmem_limit_bytes=32 * 1024 * 1024),
    )(scalars, a_v, b_v, w0p, b0p, whp, bhp, wop, bop, x_row)

    return out[0, :N].reshape(N, 1)


def init_params(key):
    """Deterministic (Xavier-uniform-like) init of the stacked per-subdomain MLPs."""
    H, L = NEURONS, N_HIDDEN_LAYERS
    k0, k1, k2 = jax.random.split(key, 3)
    lim0 = (6.0 / (1 + H)) ** 0.5
    limh = (6.0 / (H + H)) ** 0.5
    limo = (6.0 / (H + 1)) ** 0.5
    params = dict(
        w0=jax.random.uniform(k0, (N_SUBDOMAINS, 1, H), jnp.float32, -lim0, lim0),
        b0=jnp.zeros((N_SUBDOMAINS, 1, H), jnp.float32),
        wh=jax.random.uniform(k1, (N_SUBDOMAINS, L - 1, H, H), jnp.float32, -limh, limh),
        bh=jnp.zeros((N_SUBDOMAINS, L - 1, 1, H), jnp.float32),
        wo=jax.random.uniform(k2, (N_SUBDOMAINS, 1, H), jnp.float32, -limo, limo),
        bo=jnp.zeros((N_SUBDOMAINS, 1, 1), jnp.float32),
        a=jnp.asarray([DOMAIN[0] + i * WIDTH for i in range(N_SUBDOMAINS)], jnp.float32),
        b=jnp.asarray([DOMAIN[0] + (i + 1) * WIDTH for i in range(N_SUBDOMAINS)], jnp.float32),
        sigma=jnp.asarray([SIGMA], jnp.float32),
    )
    return params


def fbpinn_reference(x, params, hidden_dtype=jnp.float32):
    """Pure-JAX reference of the PyTorch forward. `hidden_dtype` mirrors the
    kernel's hidden-matmul operand dtype so the bf16 path can be checked tightly."""
    xn = 2.0 * (x - jnp.min(x)) / (jnp.max(x) - jnp.min(x)) - 1.0
    out = jnp.zeros_like(x)
    for i in range(N_SUBDOMAINS):
        a, b = params["a"][i], params["b"][i]
        left = jax.nn.sigmoid((b - x) / SIGMA)
        right = jax.nn.sigmoid((x - a) / SIGMA)
        if i == 0:
            win = left
        elif i == N_SUBDOMAINS - 1:
            win = right
        else:
            win = left * right
        h = jnp.tanh(xn * params["w0"][i] + params["b0"][i])
        for l in range(N_HIDDEN_LAYERS - 1):
            wh = params["wh"][i, l].astype(hidden_dtype)
            z = jnp.dot(h.astype(hidden_dtype), wh,
                        preferred_element_type=jnp.float32) + params["bh"][i, l]
            h = jnp.tanh(z)
        u = jnp.sum(h * params["wo"][i], axis=-1, keepdims=True) + params["bo"][i]
        out = out + win * (u * N_MULTI_SCALE)
    return out


if __name__ == "__main__":
    key = jax.random.PRNGKey(0)
    kx, kp = jax.random.split(key)
    N = 1000  # not a multiple of the tile: exercises padding; auto tile=512 -> 2 grid steps
    x = jax.random.uniform(kx, (N, 1), jnp.float32, DOMAIN[0], DOMAIN[1])
    params = init_params(kp)

    # f32 path: strict check against the PyTorch-semantics reference.
    y32 = fbpinn_forward(x, params)
    jax.block_until_ready(y32)
    y_ref32 = fbpinn_reference(x, params)
    assert y32.shape == (N, 1)
    err32 = float(jnp.max(jnp.abs(y32 - y_ref32)))
    assert bool(jnp.allclose(y32, y_ref32, atol=1e-4, rtol=1e-4)), \
        f"f32 mismatch vs reference (max |err| = {err32})"

    # bf16 hidden-matmul path (MXU-native on v6e/v7x): checked against a
    # bf16-emulating reference so the tolerance stays tight; the residual vs the
    # pure-f32 reference is the expected bf16 quantization error.
    y16 = fbpinn_forward(x, params, hidden_dtype=jnp.bfloat16)
    jax.block_until_ready(y16)
    y_ref16 = fbpinn_reference(x, params, hidden_dtype=jnp.bfloat16)
    err16 = float(jnp.max(jnp.abs(y16 - y_ref16)))
    assert bool(jnp.allclose(y16, y_ref16, atol=1e-3, rtol=1e-3)), \
        f"bf16 mismatch vs bf16-emulating reference (max |err| = {err16})"

    print("KERNEL_OK")
</pallas_src>

<mosaic_0001>
module attributes {stable_mosaic.version = 11 : i64} {
  func.func @fbpinn_kernel(%arg0: i32, %arg1: memref<3xf32, #tpu.memory_space<smem>>, %arg2: memref<4x1xf32, #tpu.memory_space<vmem>>, %arg3: memref<4x1xf32, #tpu.memory_space<vmem>>, %arg4: memref<128x1xf32, #tpu.memory_space<vmem>>, %arg5: memref<128x1xf32, #tpu.memory_space<vmem>>, %arg6: memref<1x128x128xf32, #tpu.memory_space<vmem>>, %arg7: memref<1x128x1xf32, #tpu.memory_space<vmem>>, %arg8: memref<4x128xf32, #tpu.memory_space<vmem>>, %arg9: memref<4x1xf32, #tpu.memory_space<vmem>>, %arg10: memref<1x512xf32, #tpu.memory_space<vmem>>, %arg11: memref<1x512xf32, #tpu.memory_space<vmem>>) attributes {dimension_semantics = [#tpu.dimension_semantics<parallel>], iteration_bounds = array<i64: 2>, scalar_prefetch = 0 : i64, scratch_operands = 0 : i64, tpu.core_type = #tpu.core_type<tc>, window_params = [{transform_indices = @transform_0, window_bounds = array<i64: 3>}, {pipeline_mode = #tpu.pipeline_mode<synchronous>, transform_indices = @transform_1, window_bounds = array<i64: 4, 1>}, {pipeline_mode = #tpu.pipeline_mode<synchronous>, transform_indices = @transform_2, window_bounds = array<i64: 4, 1>}, {pipeline_mode = #tpu.pipeline_mode<synchronous>, transform_indices = @transform_3, window_bounds = array<i64: 128, 1>}, {pipeline_mode = #tpu.pipeline_mode<synchronous>, transform_indices = @transform_4, window_bounds = array<i64: 128, 1>}, {pipeline_mode = #tpu.pipeline_mode<synchronous>, transform_indices = @transform_5, window_bounds = array<i64: 1, 128, 128>}, {pipeline_mode = #tpu.pipeline_mode<synchronous>, transform_indices = @transform_6, window_bounds = array<i64: 1, 128, 1>}, {pipeline_mode = #tpu.pipeline_mode<synchronous>, transform_indices = @transform_7, window_bounds = array<i64: 4, 128>}, {pipeline_mode = #tpu.pipeline_mode<synchronous>, transform_indices = @transform_8, window_bounds = array<i64: 4, 1>}, {transform_indices = @transform_9, window_bounds = array<i64: 1, 512>}, {transform_indices = @transform_10, window_bounds = array<i64: 1, 512>}]} {
    %c0 = arith.constant 0 : index
    %0 = memref.load %arg1[%c0] : memref<3xf32, #tpu.memory_space<smem>>
    %c1 = arith.constant 1 : index
    %1 = memref.load %arg1[%c1] : memref<3xf32, #tpu.memory_space<smem>>
    %c2 = arith.constant 2 : index
    %2 = memref.load %arg1[%c2] : memref<3xf32, #tpu.memory_space<smem>>
    %c0_0 = arith.constant 0 : index
    %c0_1 = arith.constant 0 : index
    %3 = vector.load %arg10[%c0_0, %c0_1] : memref<1x512xf32, #tpu.memory_space<vmem>>, vector<1x512xf32>
    %4 = vector.broadcast %0 : f32 to vector<1x512xf32>
    %5 = arith.mulf %3, %4 : vector<1x512xf32>
    %6 = vector.broadcast %1 : f32 to vector<1x512xf32>
    %7 = arith.addf %5, %6 : vector<1x512xf32>
    %c0_2 = arith.constant 0 : index
    %c0_3 = arith.constant 0 : index
    %8 = vector.load %arg4[%c0_2, %c0_3] : memref<128x1xf32, #tpu.memory_space<vmem>>, vector<128x1xf32>
    %9 = vector.broadcast %8 : vector<128x1xf32> to vector<128x512xf32>
    %10 = vector.broadcast %7 : vector<1x512xf32> to vector<128x512xf32>
    %11 = arith.mulf %9, %10 : vector<128x512xf32>
    %c0_4 = arith.constant 0 : index
    %c0_5 = arith.constant 0 : index
    %12 = vector.load %arg5[%c0_4, %c0_5] : memref<128x1xf32, #tpu.memory_space<vmem>>, vector<128x1xf32>
    %13 = vector.broadcast %12 : vector<128x1xf32> to vector<128x512xf32>
    %14 = arith.addf %11, %13 : vector<128x512xf32>
    %15 = math.tanh %14 : vector<128x512xf32>
    %c0_6 = arith.constant 0 : index
    %c0_7 = arith.constant 0 : index
    %c0_8 = arith.constant 0 : index
    %16 = vector.load %arg6[%c0_6, %c0_7, %c0_8] : memref<1x128x128xf32, #tpu.memory_space<vmem>>, vector<1x128x128xf32>
    %17 = vector.shape_cast %16 : vector<1x128x128xf32> to vector<128x128xf32>
    %cst = arith.constant dense<0.000000e+00> : vector<128x512xf32>
    %18 = tpu.matmul %17, %15, %cst {dimension_numbers = #tpu.dot_dimension_numbers<[1], [0], [0], [1], [0, 0, 1, 1], [], []>} : vector<128x128xf32>, vector<128x512xf32>, vector<128x512xf32> -> vector<128x512xf32>
    %c0_9 = arith.constant 0 : index
    %c0_10 = arith.constant 0 : index
    %c0_11 = arith.constant 0 : index
    %19 = vector.load %arg7[%c0_9, %c0_10, %c0_11] : memref<1x128x1xf32, #tpu.memory_space<vmem>>, vector<1x128x1xf32>
    %20 = vector.shape_cast %19 : vector<1x128x1xf32> to vector<128x1xf32>
    %21 = vector.broadcast %20 : vector<128x1xf32> to vector<128x512xf32>
    %22 = arith.addf %18, %21 : vector<128x512xf32>
    %23 = math.tanh %22 : vector<128x512xf32>
    %c0_12 = arith.constant 0 : index
    %c0_13 = arith.constant 0 : index
    %24 = vector.load %arg8[%c0_12, %c0_13] : memref<4x128xf32, #tpu.memory_space<vmem>>, vector<4x128xf32>
    %cst_14 = arith.constant dense<0.000000e+00> : vector<4x512xf32>
    %25 = tpu.matmul %24, %23, %cst_14 {dimension_numbers = #tpu.dot_dimension_numbers<[1], [0], [0], [1], [0, 0, 1, 1], [], []>} : vector<4x128xf32>, vector<128x512xf32>, vector<4x512xf32> -> vector<4x512xf32>
    %c0_15 = arith.constant 0 : index
    %c0_16 = arith.constant 0 : index
    %26 = vector.load %arg9[%c0_15, %c0_16] : memref<4x1xf32, #tpu.memory_space<vmem>>, vector<4x1xf32>
    %27 = vector.broadcast %26 : vector<4x1xf32> to vector<4x512xf32>
    %28 = arith.addf %25, %27 : vector<4x512xf32>
    %c0_17 = arith.constant 0 : index
    %c0_18 = arith.constant 0 : index
    %29 = vector.load %arg2[%c0_17, %c0_18] : memref<4x1xf32, #tpu.memory_space<vmem>>, vector<4x1xf32>
    %c0_19 = arith.constant 0 : index
    %c0_20 = arith.constant 0 : index
    %30 = vector.load %arg3[%c0_19, %c0_20] : memref<4x1xf32, #tpu.memory_space<vmem>>, vector<4x1xf32>
    %31 = vector.broadcast %30 : vector<4x1xf32> to vector<4x512xf32>
    %32 = vector.broadcast %3 : vector<1x512xf32> to vector<4x512xf32>
    %33 = arith.subf %31, %32 : vector<4x512xf32>
    %34 = vector.broadcast %2 : f32 to vector<4x512xf32>
    %35 = arith.mulf %33, %34 : vector<4x512xf32>
    %36 = arith.negf %35 : vector<4x512xf32>
    %37 = math.exp %36 : vector<4x512xf32>
    %cst_21 = arith.constant 1.000000e+00 : f32
    %38 = vector.broadcast %cst_21 : f32 to vector<4x512xf32>
    %39 = arith.addf %38, %37 : vector<4x512xf32>
    %40 = arith.divf %38, %39 : vector<4x512xf32>
    %41 = vector.broadcast %3 : vector<1x512xf32> to vector<4x512xf32>
    %42 = vector.broadcast %29 : vector<4x1xf32> to vector<4x512xf32>
    %43 = arith.subf %41, %42 : vector<4x512xf32>
    %44 = vector.broadcast %2 : f32 to vector<4x512xf32>
    %45 = arith.mulf %43, %44 : vector<4x512xf32>
    %46 = arith.negf %45 : vector<4x512xf32>
    %47 = math.exp %46 : vector<4x512xf32>
    %cst_22 = arith.constant 1.000000e+00 : f32
    %48 = vector.broadcast %cst_22 : f32 to vector<4x512xf32>
    %49 = arith.addf %48, %47 : vector<4x512xf32>
    %50 = arith.divf %48, %49 : vector<4x512xf32>
    %51 = tpu.iota {dimensions = array<i32: 0>} : vector<4x1xi32>
    %c0_i32 = arith.constant 0 : i32
    %52 = vector.broadcast %c0_i32 : i32 to vector<4x1xi32>
    %53 = arith.cmpi eq, %51, %52 : vector<4x1xi32>
    %c3_i32 = arith.constant 3 : i32
    %54 = vector.broadcast %c3_i32 : i32 to vector<4x1xi32>
    %55 = arith.cmpi eq, %51, %54 : vector<4x1xi32>
    %56 = arith.mulf %40, %50 : vector<4x512xf32>
    %57 = vector.shape_cast %55 : vector<4x1xi1> to vector<4x1xi1>
    %58 = vector.broadcast %57 : vector<4x1xi1> to vector<4x512xi1>
    %59 = arith.select %58, %50, %56 : vector<4x512xi1>, vector<4x512xf32>
    %60 = vector.shape_cast %53 : vector<4x1xi1> to vector<4x1xi1>
    %61 = vector.broadcast %60 : vector<4x1xi1> to vector<4x512xi1>
    %62 = arith.select %61, %40, %59 : vector<4x512xi1>, vector<4x512xf32>
    %63 = arith.mulf %62, %28 : vector<4x512xf32>
    %cst_23 = arith.constant dense<0.000000e+00> : vector<512xf32>
    %64 = vector.multi_reduction <add>, %63, %cst_23 [0] : vector<4x512xf32> to vector<512xf32>
    %65 = vector.shape_cast %64 : vector<512xf32> to vector<1x512xf32>
    %c0_24 = arith.constant 0 : index
    %c0_25 = arith.constant 0 : index
    %66 = vector.load %arg11[%c0_24, %c0_25] : memref<1x512xf32, #tpu.memory_space<vmem>>, vector<1x512xf32>
    tpu.vector_store %arg11[%c0_24, %c0_25], %65 {strides = array<i32>} : memref<1x512xf32, #tpu.memory_space<vmem>>, vector<1x512xf32>,
    return
  }
  func.func @transform_0(%arg0: i32) -> i32 {
    %c0_i32 = arith.constant 0 : i32
    %c0_i32_0 = arith.constant 0 : i32
    return %c0_i32 : i32
  }
  func.func @transform_1(%arg0: i32) -> (i32, i32) {
    %c0_i32 = arith.constant 0 : i32
    %c0_i32_0 = arith.constant 0 : i32
    %c0_i32_1 = arith.constant 0 : i32
    return %c0_i32, %c0_i32_0 : i32, i32
  }
  func.func @transform_2(%arg0: i32) -> (i32, i32) {
    %c0_i32 = arith.constant 0 : i32
    %c0_i32_0 = arith.constant 0 : i32
    %c0_i32_1 = arith.constant 0 : i32
    return %c0_i32, %c0_i32_0 : i32, i32
  }
  func.func @transform_3(%arg0: i32) -> (i32, i32) {
    %c0_i32 = arith.constant 0 : i32
    %c0_i32_0 = arith.constant 0 : i32
    %c0_i32_1 = arith.constant 0 : i32
    return %c0_i32, %c0_i32_0 : i32, i32
  }
  func.func @transform_4(%arg0: i32) -> (i32, i32) {
    %c0_i32 = arith.constant 0 : i32
    %c0_i32_0 = arith.constant 0 : i32
    %c0_i32_1 = arith.constant 0 : i32
    return %c0_i32, %c0_i32_0 : i32, i32
  }
  func.func @transform_5(%arg0: i32) -> (i32, i32, i32) {
    %c0_i32 = arith.constant 0 : i32
    %c0_i32_0 = arith.constant 0 : i32
    %c0_i32_1 = arith.constant 0 : i32
    %c0_i32_2 = arith.constant 0 : i32
    return %c0_i32, %c0_i32_0, %c0_i32_1 : i32, i32, i32
  }
  func.func @transform_6(%arg0: i32) -> (i32, i32, i32) {
    %c0_i32 = arith.constant 0 : i32
    %c0_i32_0 = arith.constant 0 : i32
    %c0_i32_1 = arith.constant 0 : i32
    %c0_i32_2 = arith.constant 0 : i32
    return %c0_i32, %c0_i32_0, %c0_i32_1 : i32, i32, i32
  }
  func.func @transform_7(%arg0: i32) -> (i32, i32) {
    %c0_i32 = arith.constant 0 : i32
    %c0_i32_0 = arith.constant 0 : i32
    %c0_i32_1 = arith.constant 0 : i32
    return %c0_i32, %c0_i32_0 : i32, i32
  }
  func.func @transform_8(%arg0: i32) -> (i32, i32) {
    %c0_i32 = arith.constant 0 : i32
    %c0_i32_0 = arith.constant 0 : i32
    %c0_i32_1 = arith.constant 0 : i32
    return %c0_i32, %c0_i32_0 : i32, i32
  }
  func.func @transform_9(%arg0: i32) -> (i32, i32) {
    %c0_i32 = arith.constant 0 : i32
    %c0_i32_0 = arith.constant 0 : i32
    return %c0_i32, %arg0 : i32, i32
  }
  func.func @transform_10(%arg0: i32) -> (i32, i32) {
    %c0_i32 = arith.constant 0 : i32
    %c0_i32_0 = arith.constant 0 : i32
    return %c0_i32, %arg0 : i32, i32
  }
}

</mosaic_0001>

<bundles_post_ra>
// kernel: fbpinn_forward.1
= control target key start
LH: loop header
LB: loop body
LE: loop exit
PB: predicated region body
PF: predicated region fallthrough
CT: control target
= control target key end

     0   :  { %15 = vsyncpa [#allocation3], 0  ;;  %s2034_s13 = smov 0   ;;  %s2926_s0 = inlined_call_operand.vmem [shape: f32[3], index: 0, kind: input, shape index: {}]   ;;  %s2927_s1 = inlined_call_operand.vmem [shape: f32[4,1], index: 1, kind: input, shape index: {}]   ;;  %s2928_s2 = inlined_call_operand.vmem [shape: f32[4,1], index: 2, kind: input, shape index: {}]   ;;  %s2929_s3 = inlined_call_operand.vmem [shape: f32[128,1], index: 3, kind: input, shape index: {}]   ;;  %s2930_s4 = inlined_call_operand.vmem [shape: f32[128,1], index: 4, kind: input, shape index: {}]   ;;  %s2931_s5 = inlined_call_operand.vmem [shape: f32[1,128,128], index: 5, kind: input, shape index: {}]   ;;  %s2932_s6 = inlined_call_operand.vmem [shape: f32[1,128,1], index: 6, kind: input, shape index: {}]   ;;  %s2933_s7 = inlined_call_operand.vmem [shape: f32[4,128], index: 7, kind: input, shape index: {}]   ;;  %s2934_s8 = inlined_call_operand.vmem [shape: f32[4,1], index: 8, kind: input, shape index: {}]   ;;  %s2935_s9 = inlined_call_operand.vmem [shape: f32[1,1024], index: 9, kind: input, shape index: {}]   ;;  %s2936_s10 = inlined_call_operand.vmem [shape: f32[1,1024], index: 10, kind: output, shape index: {}]  }
   0x1 LB: > { %s1617_s14 = sadd.s32 4294967295, %s1975_s13   ;;  %p1619_p0 = scmp.ge.s32.totalorder %s1975_s13, 1  ;;  %s1975_s13 = sphi %s2034_s13, %s21_s13  }
   0x2   : > { %p267_p1 = scmp.lt.s32.totalorder %s1975_s13, 3  ;;  %s279_s17 = sshll.u32 %s2926_s0, 4  ;;  %s280_s17 = int_to_ptr.vmem [resolvable:$true] %s279_s17 }
   0x3   : > { %p1646_p3 = scmp.eq.s32.totalorder %s1617_s14, 0  ;;  %s1977_s18 = smov [#allocation2]  }
   0x4   : > { %p268_p2 = pnand %p1619_p0, %p267_p1 }
   0x6   : > { %p1642_p4 = pneg %p268_p2  ;;  %324 = sbr.rel (%p268_p2) target bundleno = 677 (0x2a5), region = 60 }
   0x8   : > { %p1643_p5 = pnand %p1646_p3, %p1642_p4 }
   0xa   : > { %1645 = dma.vmem_to_smem (!%p1643_p5), %s280_s17, 16, %s1977_s18, [#allocation3]  }
   0xb   : > { %1970 = dma.done.wait (%p1646_p3), [#allocation3], 16  }
   0xc   : > { %1972 = vsyncadd (%p1646_p3), [#allocation3], 4294967280 }
   0xd   : > { %331 = sfence }
   0xe   : > { %v563_v0 = vld [vmem:[%s2930_s4 + $0x70] sm:$0xff]  ;;  %v564_v1 = vld [vmem:[%s2930_s4 + $0x78] sm:$0xff]  ;;  %v1978_v3 = vmov 0   ;;  %v392_v4 = vld [vmem:[%s2929_s3 + $0x60] sm:$0xff]  ;;  %s1624_s19 = sshll.u32 %s1617_s14, 2  ;;  %s372_s22 = sld [smem:[#allocation2]] }
   0xf   : > { %v395_v2 = vld [vmem:[%s2929_s3 + $0x78] sm:$0xff]  ;;  %1660 = vset.pattern.permute.xlu2 %v1978_v3  ;;  %1659 = vset.pattern.permute.xlu1 %v1978_v3  ;;  %v394_v5 = vld [vmem:[%s2929_s3 + $0x70] sm:$0xff]  ;;  %v393_v6 = vld [vmem:[%s2929_s3 + $0x68] sm:$0xff]  ;;  %p363_p6 = scmp.lt.s32.totalorder %s1624_s19, 7  ;;  %s1626_s14 = sld [smem:[#allocation2 + $0x1]] }
  0x10   : > { %1658 = vset.pattern.permute.xlu0 %v1978_v3  ;;  %637 = vperm.xlu2 %1660, %v563_v0   ;;  %v561_v7 = vld [vmem:[%s2930_s4 + $0x60] sm:$0xff]  ;;  %v562_v8 = vld [vmem:[%s2930_s4 + $0x68] sm:$0xff]  ;;  %v391_v9 = vld [vmem:[%s2929_s3 + $0x58] sm:$0xff]  ;;  %s1627_s20 = sld [smem:[#allocation2 + $0x2]] }
  0x11   : > { %642 = vperm.xlu1 %1659, %v564_v1   ;;  %473 = vperm.xlu0 %1658, %v395_v2   ;;  %v389_v10 = vld [vmem:[%s2929_s3 + $0x48] sm:$0xff]  ;;  %v560_v11 = vld [vmem:[%s2930_s4 + $0x58] sm:$0xff]  ;;  %v390_v12 = vld [vmem:[%s2929_s3 + $0x50] sm:$0xff]  ;;  %s3006_s19 = smov (!%p363_p6, %s1624_s19), 7 }
  0x12   : > { %v558_v13 = vld [vmem:[%s2930_s4 + $0x48] sm:$0xff]  ;;  %v559_v14 = vld [vmem:[%s2930_s4 + $0x50] sm:$0xff]  ;;  %v388_v15 = vld [vmem:[%s2929_s3 + $0x40] sm:$0xff]  ;;  %s2174_s29 = scalar_lea.vmem %s2935_s9, %s3006_s19 }
  0x13   : > { %v386_v16 = vld [vmem:[%s2929_s3 + $0x30] sm:$0xff]  ;;  %v557_v17 = vld [vmem:[%s2930_s4 + $0x40] sm:$0xff]  ;;  %v387_v18 = vld [vmem:[%s2929_s3 + $0x38] sm:$0xff] }
  0x14   : > { %v555_v19 = vld [vmem:[%s2930_s4 + $0x30] sm:$0xff]  ;;  %v556_v20 = vld [vmem:[%s2930_s4 + $0x38] sm:$0xff]  ;;  %v385_v21 = vld [vmem:[%s2929_s3 + $0x28] sm:$0xff]  ;;  %v376_v42 = vstv %s372_s22  ;;  %s370_s22 = scalar_lea.vmem %s2936_s10, %s3006_s19 }
  0x15   : > { %v383_v22 = vld [vmem:[%s2929_s3 + $0x18] sm:$0xff]  ;;  %v554_v23 = vld [vmem:[%s2930_s4 + $0x28] sm:$0xff]  ;;  %v384_v24 = vld [vmem:[%s2929_s3 + $0x20] sm:$0xff]  ;;  %v378_v48 = vstv %s1626_s14 }
  0x16   : > { %v552_v25 = vld [vmem:[%s2930_s4 + $0x18] sm:$0xff]  ;;  %v553_v26 = vld [vmem:[%s2930_s4 + $0x20] sm:$0xff]  ;;  %v382_v27 = vld [vmem:[%s2929_s3 + $0x10] sm:$0xff] }
  0x17   : > { %v380_v28 = vld [vmem:[%s2929_s3] sm:$0xff]  ;;  %v551_v29 = vld [vmem:[%s2930_s4 + $0x10] sm:$0xff]  ;;  %v381_v30 = vld [vmem:[%s2929_s3 + $0x8] sm:$0xff] }
  0x18   : > { %458 = vperm.xlu2 %1660, %v392_v4   ;;  %v804_v31 = vld [vmem:[%s2932_s6 + $0x78] sm:$0xff]  ;;  %v549_v32 = vld [vmem:[%s2930_s4] sm:$0xff]  ;;  %v550_v33 = vld [vmem:[%s2930_s4 + $0x8] sm:$0xff] }
  0x19   : > { %468 = vperm.xlu0 %1658, %v394_v5   ;;  %463 = vperm.xlu1 %1659, %v393_v6   ;;  %v801_v34 = vld [vmem:[%s2932_s6 + $0x60] sm:$0xff]  ;;  %v802_v35 = vld [vmem:[%s2932_s6 + $0x68] sm:$0xff]  ;;  %v803_v36 = vld [vmem:[%s2932_s6 + $0x70] sm:$0xff] }
  0x1a   : > { %v798_v38 = vld [vmem:[%s2932_s6 + $0x48] sm:$0xff]  ;;  %v799_v39 = vld [vmem:[%s2932_s6 + $0x50] sm:$0xff]  ;;  %v800_v40 = vld [vmem:[%s2932_s6 + $0x58] sm:$0xff] }
  0x1b   : > { %v375_v41 = vld [vmem:[%s2174_s29] sm:$0xf]  ;;  %v795_v43 = vld [vmem:[%s2932_s6 + $0x30] sm:$0xff]  ;;  %v796_v45 = vld [vmem:[%s2932_s6 + $0x38] sm:$0xff] }
  0x1c   : > { %v797_v46 = vld [vmem:[%s2932_s6 + $0x40] sm:$0xff]  ;;  %v377_v47 = vmul.f32 %v376_v42, %v375_v41  ;;  %v792_v50 = vld [vmem:[%s2932_s6 + $0x18] sm:$0xff]  ;;  %v794_v52 = vld [vmem:[%s2932_s6 + $0x28] sm:$0xff] }
  0x1d   : > { %v793_v51 = vld [vmem:[%s2932_s6 + $0x20] sm:$0xff]  ;;  %v790_v0 = vld [vmem:[%s2932_s6 + $0x8] sm:$0xff]  ;;  %v791_v1 = vld [vmem:[%s2932_s6 + $0x10] sm:$0xff] }
  0x1e   : > { %v379_v49 = vadd.f32 %v378_v48, %v377_v47  ;;  %v789_v62 = vld [vmem:[%s2932_s6] sm:$0xff] }
  0x20   : > { %627 = vperm.xlu2 %1660, %v561_v7   ;;  %v2195_v53 = vperm.slane %v379_v49, 0  ;;  %v2197_v54 = vperm.slane %v379_v49, 1  ;;  %v2199_v55 = vperm.slane %v379_v49, 2  ;;  %v2207_v63 = vperm.slane %v379_v49, 3 }
  0x21   : > { %632 = vperm.xlu0 %1658, %v562_v8   ;;  %453 = vperm.xlu1 %1659, %v391_v9  }
  0x28   : > { %443 = vperm.xlu2 %1660, %v389_v10  }
  0x29   : > { %622 = vperm.xlu1 %1659, %v560_v11   ;;  %448 = vperm.xlu0 %1658, %v390_v12  }
  0x30   : > { %612 = vperm.xlu2 %1660, %v558_v13  }
  0x31   : > { %617 = vperm.xlu0 %1658, %v559_v14   ;;  %438 = vperm.xlu1 %1659, %v388_v15   ;;  %v1210_v15 = vld [vmem:[%s2934_s8] sm:$0xf] }
  0x38   : > { %428 = vperm.xlu2 %1660, %v386_v16  }
  0x39   : > { %607 = vperm.xlu1 %1659, %v557_v17   ;;  %433 = vperm.xlu0 %1658, %v387_v18   ;;  %v1296_v18 = vld [vmem:[%s2927_s1] sm:$0xf] }
  0x40   : > { %597 = vperm.xlu2 %1660, %v555_v19  }
  0x41   : > { %602 = vperm.xlu0 %1658, %v556_v20   ;;  %423 = vperm.xlu1 %1659, %v385_v21   ;;  %v1297_v21 = vld [vmem:[%s2928_s2] sm:$0xf] }
  0x48   : > { %413 = vperm.xlu2 %1660, %v383_v22  }
  0x49   : > { %592 = vperm.xlu1 %1659, %v554_v23   ;;  %418 = vperm.xlu0 %1658, %v384_v24  }
  0x50   : > { %582 = vperm.xlu2 %1660, %v552_v25  }
  0x51   : > { %587 = vperm.xlu0 %1658, %v553_v26   ;;  %408 = vperm.xlu1 %1659, %v382_v27  }
  0x58   : > { %398 = vperm.xlu2 %1660, %v380_v28  }
  0x59   : > { %577 = vperm.xlu1 %1659, %v551_v29   ;;  %403 = vperm.xlu0 %1658, %v381_v30  }
  0x60   : > { %882 = vperm.xlu2 %1660, %v804_v31  }
  0x61   : > { %567 = vperm.xlu1 %1659, %v549_v32   ;;  %572 = vperm.xlu0 %1658, %v550_v33  }
  0x68   : > { %867 = vperm.xlu2 %1660, %v801_v34  }
  0x69   : > { %872 = vperm.xlu1 %1659, %v802_v35   ;;  %877 = vperm.xlu0 %1658, %v803_v36  }
  0x6a   : > { %v2157_v37 = vpop.permute.xlu2 %637 }
  0x70   : > { %852 = vperm.xlu2 %1660, %v798_v38  }
  0x71   : > { %857 = vperm.xlu1 %1659, %v799_v39   ;;  %862 = vperm.xlu0 %1658, %v800_v40  }
  0x72   : > { %v459_v44 = vpop.permute.xlu2 %458 }
  0x73   : > { %v533_v5 = vmul.f32 %v2195_v53, %v459_v44  ;;  %v534_v6 = vmul.f32 %v2197_v54, %v459_v44  ;;  %v535_v9 = vmul.f32 %v2199_v55, %v459_v44  ;;  %v536_v13 = vmul.f32 %v2207_v63, %v459_v44 }
  0x78   : > { %837 = vperm.xlu2 %1660, %v795_v43  }
  0x79   : > { %842 = vperm.xlu1 %1659, %v796_v45   ;;  %847 = vperm.xlu0 %1658, %v797_v46  }
  0x7a   : > { %v628_v56 = vpop.permute.xlu2 %627 }
  0x7b   : > { %v693_v12 = vadd.f32 %v628_v56, %v533_v5  ;;  %v694_v14 = vadd.f32 %v628_v56, %v534_v6  ;;  %v695_v20 = vadd.f32 %v628_v56, %v535_v9  ;;  %v696_v23 = vadd.f32 %v628_v56, %v536_v13 }
  0x80   : > { %822 = vperm.xlu2 %1660, %v792_v50  }
  0x81   : > { %827 = vperm.xlu1 %1659, %v793_v51   ;;  %832 = vperm.xlu0 %1658, %v794_v52  }
  0x82   : > { %v2217_v7 = vpop.permute.xlu2 %443 }
  0x83   : > { %v643_v57 = vpop.permute.xlu1 %642  ;;  %v474_v58 = vpop.permute.xlu0 %473  ;;  %v521_v52 = vmul.f32 %v2195_v53, %v2217_v7 }
  0x84   : > { %v545_v59 = vmul.f32 %v2195_v53, %v474_v58  ;;  %v546_v60 = vmul.f32 %v2197_v54, %v474_v58  ;;  %v547_v61 = vmul.f32 %v2199_v55, %v474_v58  ;;  %v548_v8 = vmul.f32 %v2207_v63, %v474_v58 }
  0x86   : > { %v705_v2 = vadd.f32 %v643_v57, %v545_v59  ;;  %v706_v3 = vadd.f32 %v643_v57, %v546_v60  ;;  %v707_v4 = vadd.f32 %v643_v57, %v547_v61  ;;  %v708_v17 = vadd.f32 %v643_v57, %v548_v8 }
  0x88   : > { %807 = vperm.xlu2 %1660, %v789_v62   ;;  %1661 = vtanh.f32 %v705_v2 }
  0x89   : > { %812 = vperm.xlu1 %1659, %v790_v0   ;;  %817 = vperm.xlu0 %1658, %v791_v1   ;;  %1663 = vtanh.f32 %v706_v3  ;;  %v522_v0 = vmul.f32 %v2197_v54, %v2217_v7 }
  0x8a   : > { %1665 = vtanh.f32 %v707_v4  ;;  %v2238_v33 = vpop.permute.xlu2 %612 }
  0x8b   : > { %v469_v10 = vpop.permute.xlu0 %468  ;;  %v464_v11 = vpop.permute.xlu1 %463  ;;  %1667 = vtanh.f32 %v693_v12  ;;  %v681_v6 = vadd.f32 %v2238_v33, %v521_v52  ;;  %v682_v9 = vadd.f32 %v2238_v33, %v522_v0 }
  0x8c   : > { %1669 = vtanh.f32 %v694_v14  ;;  %v541_v24 = vmul.f32 %v2195_v53, %v469_v10  ;;  %v537_v25 = vmul.f32 %v2195_v53, %v464_v11  ;;  %v538_v26 = vmul.f32 %v2197_v54, %v464_v11 }
  0x8d   : > { %v539_v27 = vmul.f32 %v2199_v55, %v464_v11  ;;  %1671 = vtanh.f32 %v708_v17  ;;  %v542_v28 = vmul.f32 %v2197_v54, %v469_v10  ;;  %v540_v29 = vmul.f32 %v2207_v63, %v464_v11 }
  0x8e   : > { %v1662_v16 = vpop.eup %1661  ;;  %1673 = vtanh.f32 %v695_v20  ;;  %v543_v32 = vmul.f32 %v2199_v55, %v469_v10  ;;  %v544_v38 = vmul.f32 %v2207_v63, %v469_v10  ;;  %v701_v41 = vadd.f32 %v2157_v37, %v541_v24 }
  0x8f   : > { %v1664_v19 = vpop.eup %1663  ;;  %885 = vmatpush.msra.mxu0 %v1662_v16  ;;  %1675 = vtanh.f32 %v696_v23  ;;  %v702_v43 = vadd.f32 %v2157_v37, %v542_v28  ;;  %v523_v11 = vmul.f32 %v2199_v55, %v2217_v7  ;;  %v524_v16 = vmul.f32 %v2207_v63, %v2217_v7 }
  0x90   : > { %v1666_v22 = vpop.eup %1665  ;;  %950 = vmatpush.msra.mxu1 %v1664_v19  ;;  %1213 = vperm.xlu2 %1660, %v1210_v15   ;;  %v703_v45 = vadd.f32 %v2157_v37, %v543_v32  ;;  %v704_v47 = vadd.f32 %v2157_v37, %v544_v38 }
  0x91   : > { %1015 = vmatpush.msra.mxu2 %v1666_v22  ;;  %1399 = vperm.xlu1 %1659, %v1296_v18   ;;  %v2241_v40 = vpop.eup %1667  ;;  %v684_v28 = vadd.f32 %v2238_v33, %v524_v16 }
  0x92   : > { %1300 = vperm.xlu0 %1658, %v1297_v21   ;;  %v2244_v42 = vpop.eup %1669  ;;  %v2259_v3 = vpop.permute.xlu2 %428 }
  0x93   : > { %v633_v30 = vpop.permute.xlu0 %632  ;;  %v454_v31 = vpop.permute.xlu1 %453 }
  0x94   : > { %v697_v34 = vadd.f32 %v633_v30, %v537_v25  ;;  %v698_v35 = vadd.f32 %v633_v30, %v538_v26  ;;  %v699_v36 = vadd.f32 %v633_v30, %v539_v27  ;;  %v700_v39 = vadd.f32 %v633_v30, %v540_v29  ;;  %v1672_v44 = vpop.eup %1671 }
  0x95   : > { %v2248_v46 = vpop.eup %1673  ;;  %1080 = vmatpush.msra.mxu3 %v1672_v44  ;;  %v529_v48 = vmul.f32 %v2195_v53, %v454_v31  ;;  %v530_v49 = vmul.f32 %v2197_v54, %v454_v31  ;;  %v531_v50 = vmul.f32 %v2199_v55, %v454_v31  ;;  %v532_v56 = vmul.f32 %v2207_v63, %v454_v31 }
  0x96   : > { %1677 = vtanh.f32 %v697_v34  ;;  %v1676_v51 = vpop.eup %1675  ;;  %v683_v26 = vadd.f32 %v2238_v33, %v523_v11 }
  0x97   : > { %1679 = vtanh.f32 %v698_v35 }
  0x98   : > { %1681 = vtanh.f32 %v699_v36 }
  0x99   : > { %1683 = vtanh.f32 %v700_v39 }
  0x9a   : > { %1685 = vtanh.f32 %v701_v41  ;;  %v2276_v29 = vpop.permute.xlu2 %597 }
  0x9b   : > { %1687 = vtanh.f32 %v702_v43  ;;  %v623_v57 = vpop.permute.xlu1 %622  ;;  %v449_v58 = vpop.permute.xlu0 %448 }
  0x9c   : > { %v1678_v59 = vpop.eup %1677  ;;  %1689 = vtanh.f32 %v703_v45  ;;  %v689_v60 = vadd.f32 %v623_v57, %v529_v48  ;;  %v690_v37 = vadd.f32 %v623_v57, %v530_v49  ;;  %v691_v61 = vadd.f32 %v623_v57, %v531_v50 }
  0x9d   : > { %v1680_v62 = vpop.eup %1679  ;;  %1691 = vtanh.f32 %v704_v47  ;;  %v692_v1 = vadd.f32 %v623_v57, %v532_v56  ;;  %v525_v12 = vmul.f32 %v2195_v53, %v449_v58  ;;  %v526_v13 = vmul.f32 %v2197_v54, %v449_v58 }
  0x9e   : > { %v1682_v2 = vpop.eup %1681  ;;  %1693 = vtanh.f32 %v689_v60  ;;  %v527_v14 = vmul.f32 %v2199_v55, %v449_v58  ;;  %v528_v17 = vmul.f32 %v2207_v63, %v449_v58  ;;  %v510_v48 = vmul.f32 %v2197_v54, %v2259_v3 }
  0x9f   : > { %v1684_v4 = vpop.eup %1683  ;;  %1695 = vtanh.f32 %v690_v37  ;;  %v511_v60 = vmul.f32 %v2199_v55, %v2259_v3 }
  0xa0   : > { %v1686_v5 = vpop.eup %1685  ;;  %1697 = vtanh.f32 %v691_v61  ;;  %v670_v52 = vadd.f32 %v2276_v29, %v510_v48 }
  0xa1   : > { %v1688_v8 = vpop.eup %1687  ;;  %886 = vmatpush.msra.mxu0 %v1686_v5  ;;  %1699 = vtanh.f32 %v692_v1 }
  0xa2   : > { %v1690_v10 = vpop.eup %1689  ;;  %951 = vmatpush.msra.mxu1 %v1688_v8  ;;  %1701 = vtanh.f32 %v681_v6  ;;  %v2288_v56 = vpop.permute.xlu2 %413  ;;  %v512_v6 = vmul.f32 %v2207_v63, %v2259_v3 }
  0xa3   : > { %v1692_v15 = vpop.eup %1691  ;;  %1016 = vmatpush.msra.mxu2 %v1690_v10  ;;  %887 = vmatpush.msra.mxu0 %v1678_v59  ;;  %v618_v18 = vpop.permute.xlu0 %617  ;;  %1703 = vtanh.f32 %v682_v9  ;;  %v671_v10 = vadd.f32 %v2276_v29, %v511_v60 }
  0xa4   : > { %v439_v19 = vpop.permute.xlu1 %438  ;;  %v1694_v20 = vpop.eup %1693  ;;  %1081 = vmatpush.msra.mxu3 %v1692_v15  ;;  %952 = vmatpush.msra.mxu1 %v1680_v62  ;;  %v685_v21 = vadd.f32 %v618_v18, %v525_v12  ;;  %v686_v22 = vadd.f32 %v618_v18, %v526_v13  ;;  %v687_v23 = vadd.f32 %v618_v18, %v527_v14 }
  0xa5   : > { %v1696_v24 = vpop.eup %1695  ;;  %1017 = vmatpush.msra.mxu2 %v1682_v2  ;;  %888 = vmatpush.msra.mxu0 %v2241_v40  ;;  %v688_v25 = vadd.f32 %v618_v18, %v528_v17  ;;  %v517_v31 = vmul.f32 %v2195_v53, %v439_v19  ;;  %v518_v32 = vmul.f32 %v2197_v54, %v439_v19 }
  0xa6   : > { %v1698_v7 = vpop.eup %1697  ;;  %1082 = vmatpush.msra.mxu3 %v1684_v4  ;;  %953 = vmatpush.msra.mxu1 %v2244_v42  ;;  %1705 = vtanh.f32 %v685_v21  ;;  %v519_v34 = vmul.f32 %v2199_v55, %v439_v19  ;;  %v520_v35 = vmul.f32 %v2207_v63, %v439_v19  ;;  %v672_v12 = vadd.f32 %v2276_v29, %v512_v6 }
  0xa7   : > { %v1700_v27 = vpop.eup %1699  ;;  %1018 = vmatpush.msra.mxu2 %v2248_v46  ;;  %1707 = vtanh.f32 %v686_v22  ;;  %889 = vmatpush.msra.mxu0 %v1694_v20  ;;  %v509_v46 = vmul.f32 %v2195_v53, %v2259_v3 }
  0xa8   : > { %1083 = vmatpush.msra.mxu3 %v1676_v51  ;;  %1709 = vtanh.f32 %v687_v23  ;;  %954 = vmatpush.msra.mxu1 %v1696_v24  ;;  %v1702_v30 = vpop.eup %1701 }
  0xa9   : > { %1711 = vtanh.f32 %v688_v25  ;;  %1019 = vmatpush.msra.mxu2 %v1698_v7  ;;  %v1704_v33 = vpop.eup %1703  ;;  %v669_v50 = vadd.f32 %v2276_v29, %v509_v46  ;;  %v498_v29 = vmul.f32 %v2197_v54, %v2288_v56 }
  0xaa   : > { %1713 = vtanh.f32 %v683_v26  ;;  %1084 = vmatpush.msra.mxu3 %v1700_v27  ;;  %v583_v25 = vpop.permute.xlu2 %582  ;;  %v497_v27 = vmul.f32 %v2195_v53, %v2288_v56 }
  0xab   : > { %1715 = vtanh.f32 %v684_v28  ;;  %v434_v38 = vpop.permute.xlu0 %433 }
  0xac   : > { %v608_v36 = vpop.permute.xlu1 %607  ;;  %v1706_v39 = vpop.eup %1705  ;;  %v513_v57 = vmul.f32 %v2195_v53, %v434_v38  ;;  %v514_v58 = vmul.f32 %v2197_v54, %v434_v38  ;;  %v515_v59 = vmul.f32 %v2199_v55, %v434_v38  ;;  %v516_v37 = vmul.f32 %v2207_v63, %v434_v38 }
  0xad   : > { %v677_v40 = vadd.f32 %v608_v36, %v517_v31  ;;  %v678_v41 = vadd.f32 %v608_v36, %v518_v32  ;;  %v679_v42 = vadd.f32 %v608_v36, %v519_v34  ;;  %v1708_v43 = vpop.eup %1707  ;;  %v680_v44 = vadd.f32 %v608_v36, %v520_v35  ;;  %890 = vmatpush.msra.mxu0 %v1706_v39 }
  0xae   : > { %v1710_v45 = vpop.eup %1709  ;;  %955 = vmatpush.msra.mxu1 %v1708_v43  ;;  %v657_v31 = vadd.f32 %v583_v25, %v497_v27  ;;  %v658_v34 = vadd.f32 %v583_v25, %v498_v29  ;;  %v499_v38 = vmul.f32 %v2199_v55, %v2288_v56 }
  0xaf   : > { %1717 = vtanh.f32 %v677_v40  ;;  %v1712_v47 = vpop.eup %1711  ;;  %1020 = vmatpush.msra.mxu2 %v1710_v45  ;;  %891 = vmatpush.msra.mxu0 %v1702_v30 }
  0xb0   : > { %1719 = vtanh.f32 %v678_v41  ;;  %v1714_v49 = vpop.eup %1713  ;;  %1085 = vmatpush.msra.mxu3 %v1712_v47  ;;  %956 = vmatpush.msra.mxu1 %v1704_v33  ;;  %v500_v47 = vmul.f32 %v2207_v63, %v2288_v56 }
  0xb1   : > { %1721 = vtanh.f32 %v679_v42  ;;  %v1716_v51 = vpop.eup %1715  ;;  %1021 = vmatpush.msra.mxu2 %v1714_v49 }
  0xb2   : > { %1723 = vtanh.f32 %v680_v44  ;;  %1086 = vmatpush.msra.mxu3 %v1716_v51 }
  0xb3   : > { %v603_v61 = vpop.permute.xlu0 %602  ;;  %1725 = vtanh.f32 %v669_v50  ;;  %v659_v50 = vadd.f32 %v583_v25, %v499_v38 }
  0xb4   : > { %v424_v62 = vpop.permute.xlu1 %423  ;;  %v673_v1 = vadd.f32 %v603_v61, %v513_v57  ;;  %v674_v2 = vadd.f32 %v603_v61, %v514_v58  ;;  %v675_v4 = vadd.f32 %v603_v61, %v515_v59  ;;  %1727 = vtanh.f32 %v670_v52 }
  0xb5   : > { %v1718_v0 = vpop.eup %1717  ;;  %v676_v8 = vadd.f32 %v603_v61, %v516_v37  ;;  %v505_v3 = vmul.f32 %v2195_v53, %v424_v62  ;;  %v506_v14 = vmul.f32 %v2197_v54, %v424_v62  ;;  %v507_v15 = vmul.f32 %v2199_v55, %v424_v62 }
  0xb6   : > { %v1720_v5 = vpop.eup %1719  ;;  %892 = vmatpush.msra.mxu0 %v1718_v0  ;;  %1729 = vtanh.f32 %v673_v1  ;;  %v508_v17 = vmul.f32 %v2207_v63, %v424_v62  ;;  %v660_v52 = vadd.f32 %v583_v25, %v500_v47  ;;  %v782_v47 = vld [vmem:[%s2931_s5 + $0x48] sm:$0xff] }
  0xb7   : > { %v1722_v9 = vpop.eup %1721  ;;  %957 = vmatpush.msra.mxu1 %v1720_v5  ;;  %1731 = vtanh.f32 %v674_v2 }
  0xb8   : > { %v1724_v11 = vpop.eup %1723  ;;  %1022 = vmatpush.msra.mxu2 %v1722_v9  ;;  %1733 = vtanh.f32 %v675_v4 }
  0xb9   : > { %1087 = vmatpush.msra.mxu3 %v1724_v11  ;;  %1735 = vtanh.f32 %v676_v8  ;;  %v1726_v13 = vpop.eup %1725 }
  0xba   : > { %1737 = vtanh.f32 %v671_v10  ;;  %v1728_v16 = vpop.eup %1727  ;;  %v399_v10 = vpop.permute.xlu2 %398 }
  0xbb   : > { %1739 = vtanh.f32 %v672_v12  ;;  %v419_v19 = vpop.permute.xlu0 %418  ;;  %v487_v27 = vmul.f32 %v2199_v55, %v399_v10 }
  0xbc   : > { %v593_v18 = vpop.permute.xlu1 %592  ;;  %v1730_v20 = vpop.eup %1729  ;;  %v501_v33 = vmul.f32 %v2195_v53, %v419_v19  ;;  %v502_v35 = vmul.f32 %v2197_v54, %v419_v19  ;;  %v503_v36 = vmul.f32 %v2199_v55, %v419_v19  ;;  %v504_v39 = vmul.f32 %v2207_v63, %v419_v19 }
  0xbd   : > { %v665_v21 = vadd.f32 %v593_v18, %v505_v3  ;;  %v666_v22 = vadd.f32 %v593_v18, %v506_v14  ;;  %v667_v23 = vadd.f32 %v593_v18, %v507_v15  ;;  %v1732_v24 = vpop.eup %1731  ;;  %v668_v7 = vadd.f32 %v593_v18, %v508_v17  ;;  %893 = vmatpush.msra.mxu0 %v1730_v20 }
  0xbe   : > { %v1734_v26 = vpop.eup %1733  ;;  %958 = vmatpush.msra.mxu1 %v1732_v24  ;;  %v486_v3 = vmul.f32 %v2197_v54, %v399_v10 }
  0xbf   : > { %1741 = vtanh.f32 %v665_v21  ;;  %v1736_v28 = vpop.eup %1735  ;;  %1023 = vmatpush.msra.mxu2 %v1734_v26  ;;  %894 = vmatpush.msra.mxu0 %v1726_v13  ;;  %v485_v13 = vmul.f32 %v2195_v53, %v399_v10 }
  0xc0   : > { %1743 = vtanh.f32 %v666_v22  ;;  %v1738_v30 = vpop.eup %1737  ;;  %1088 = vmatpush.msra.mxu3 %v1736_v28  ;;  %959 = vmatpush.msra.mxu1 %v1728_v16  ;;  %v488_v28 = vmul.f32 %v2207_v63, %v399_v10 }
  0xc1   : > { %1745 = vtanh.f32 %v667_v23  ;;  %v1740_v32 = vpop.eup %1739  ;;  %1024 = vmatpush.msra.mxu2 %v1738_v30 }
  0xc2   : > { %1747 = vtanh.f32 %v668_v7  ;;  %1089 = vmatpush.msra.mxu3 %v1740_v32 }
  0xc3   : > { %v588_v40 = vpop.permute.xlu0 %587  ;;  %1749 = vtanh.f32 %v657_v31 }
  0xc4   : > { %v409_v41 = vpop.permute.xlu1 %408  ;;  %v661_v43 = vadd.f32 %v588_v40, %v501_v33  ;;  %v662_v44 = vadd.f32 %v588_v40, %v502_v35  ;;  %v663_v45 = vadd.f32 %v588_v40, %v503_v36  ;;  %1751 = vtanh.f32 %v658_v34 }
  0xc5   : > { %v1742_v42 = vpop.eup %1741  ;;  %v664_v48 = vadd.f32 %v588_v40, %v504_v39  ;;  %v493_v58 = vmul.f32 %v2195_v53, %v409_v41  ;;  %v494_v56 = vmul.f32 %v2197_v54, %v409_v41  ;;  %v495_v59 = vmul.f32 %v2199_v55, %v409_v41  ;;  %v774_v39 = vld [vmem:[%s2931_s5 + $0x8] sm:$0xff]  ;;  %v775_v40 = vld [vmem:[%s2931_s5 + $0x10] sm:$0xff] }
  0xc6   : > { %v1744_v46 = vpop.eup %1743  ;;  %895 = vmatpush.msra.mxu0 %v1742_v42  ;;  %1753 = vtanh.f32 %v661_v43  ;;  %v496_v37 = vmul.f32 %v2207_v63, %v409_v41  ;;  %v776_v41 = vld [vmem:[%s2931_s5 + $0x18] sm:$0xff]  ;;  %v777_v42 = vld [vmem:[%s2931_s5 + $0x20] sm:$0xff]  ;;  %v778_v43 = vld [vmem:[%s2931_s5 + $0x28] sm:$0xff] }
  0xc7   : > { %v1746_v49 = vpop.eup %1745  ;;  %960 = vmatpush.msra.mxu1 %v1744_v46  ;;  %1755 = vtanh.f32 %v662_v44  ;;  %v779_v44 = vld [vmem:[%s2931_s5 + $0x30] sm:$0xff]  ;;  %v781_v46 = vld [vmem:[%s2931_s5 + $0x40] sm:$0xff] }
  0xc8   : > { %v1748_v51 = vpop.eup %1747  ;;  %1025 = vmatpush.msra.mxu2 %v1746_v49  ;;  %1757 = vtanh.f32 %v663_v45  ;;  %v780_v45 = vld [vmem:[%s2931_s5 + $0x38] sm:$0xff] }
  0xc9   : > { %1090 = vmatpush.msra.mxu3 %v1748_v51  ;;  %1759 = vtanh.f32 %v664_v48  ;;  %v1750_v57 = vpop.eup %1749  ;;  %v783_v48 = vld [vmem:[%s2931_s5 + $0x50] sm:$0xff]  ;;  %v784_v49 = vld [vmem:[%s2931_s5 + $0x58] sm:$0xff]  ;;  %v786_v51 = vld [vmem:[%s2931_s5 + $0x68] sm:$0xff] }
  0xca   : > { %1761 = vtanh.f32 %v659_v50  ;;  %v1752_v60 = vpop.eup %1751  ;;  %v785_v50 = vld [vmem:[%s2931_s5 + $0x60] sm:$0xff] }
  0xcb   : > { %1763 = vtanh.f32 %v660_v52  ;;  %v404_v62 = vpop.permute.xlu0 %403  ;;  %v787_v52 = vld [vmem:[%s2931_s5 + $0x70] sm:$0xff] }
  0xcc   : > { %v578_v61 = vpop.permute.xlu1 %577  ;;  %v1754_v0 = vpop.eup %1753  ;;  %v489_v17 = vmul.f32 %v2195_v53, %v404_v62  ;;  %v490_v20 = vmul.f32 %v2197_v54, %v404_v62  ;;  %v491_v23 = vmul.f32 %v2199_v55, %v404_v62  ;;  %v492_v7 = vmul.f32 %v2207_v63, %v404_v62  ;;  %v773_v63 = vld [vmem:[%s2931_s5] sm:$0xff] }
  0xcd   : > { %v653_v1 = vadd.f32 %v578_v61, %v493_v58  ;;  %v654_v2 = vadd.f32 %v578_v61, %v494_v56  ;;  %v655_v4 = vadd.f32 %v578_v61, %v495_v59  ;;  %v1756_v5 = vpop.eup %1755  ;;  %v656_v6 = vadd.f32 %v578_v61, %v496_v37  ;;  %896 = vmatpush.msra.mxu0 %v1754_v0 }
  0xce   : > { %v1758_v8 = vpop.eup %1757  ;;  %961 = vmatpush.msra.mxu1 %v1756_v5 }
  0xcf   : > { %1765 = vtanh.f32 %v653_v1  ;;  %v1760_v9 = vpop.eup %1759  ;;  %1026 = vmatpush.msra.mxu2 %v1758_v8  ;;  %897 = vmatpush.msra.mxu0 %v1750_v57  ;;  %v788_v57 = vld [vmem:[%s2931_s5 + $0x78] sm:$0xff] }
  0xd0   : > { %1767 = vtanh.f32 %v654_v2  ;;  %v1762_v11 = vpop.eup %1761  ;;  %1091 = vmatpush.msra.mxu3 %v1760_v9  ;;  %962 = vmatpush.msra.mxu1 %v1752_v60 }
  0xd1   : > { %1769 = vtanh.f32 %v655_v4  ;;  %v1764_v12 = vpop.eup %1763  ;;  %1027 = vmatpush.msra.mxu2 %v1762_v11 }
  0xd2   : > { %1771 = vtanh.f32 %v656_v6  ;;  %1092 = vmatpush.msra.mxu3 %v1764_v12 }
  0xd3   : > { %v573_v15 = vpop.permute.xlu0 %572 }
  0xd4   : > { %v568_v14 = vpop.permute.xlu1 %567  ;;  %v649_v24 = vadd.f32 %v573_v15, %v489_v17  ;;  %v650_v26 = vadd.f32 %v573_v15, %v490_v20  ;;  %v651_v53 = vadd.f32 %v573_v15, %v491_v23  ;;  %v652_v54 = vadd.f32 %v573_v15, %v492_v7 }
  0xd5   : > { %v1766_v16 = vpop.eup %1765  ;;  %v645_v18 = vadd.f32 %v568_v14, %v485_v13  ;;  %v646_v21 = vadd.f32 %v568_v14, %v486_v3  ;;  %v647_v29 = vadd.f32 %v568_v14, %v487_v27  ;;  %v648_v30 = vadd.f32 %v568_v14, %v488_v28 }
  0xd6   : > { %v1768_v19 = vpop.eup %1767  ;;  %898 = vmatpush.msra.mxu0 %v1766_v16  ;;  %v2414_v16 = vpop.permute.xlu2 %882 }
  0xd7   : > { %v1770_v22 = vpop.eup %1769  ;;  %963 = vmatpush.msra.mxu1 %v1768_v19  ;;  %1773 = vtanh.f32 %v645_v18 }
  0xd8   : > { %v1772_v25 = vpop.eup %1771  ;;  %1028 = vmatpush.msra.mxu2 %v1770_v22  ;;  %1775 = vtanh.f32 %v646_v21 }
  0xd9   : > { %1093 = vmatpush.msra.mxu3 %v1772_v25  ;;  %1777 = vtanh.f32 %v649_v24 }
  0xda   : > { %1779 = vtanh.f32 %v650_v26 }
  0xdb   : > { %1781 = vtanh.f32 %v651_v53  ;;  %v2428_v23 = vpop.permute.xlu0 %877 }
  0xdc   : > { %1783 = vtanh.f32 %v652_v54  ;;  %v2426_v22 = vpop.permute.xlu1 %872 }
  0xdd   : > { %v1774_v31 = vpop.eup %1773  ;;  %1785 = vtanh.f32 %v647_v29 }
  0xde   : > { %v1776_v32 = vpop.eup %1775  ;;  %1787 = vtanh.f32 %v648_v30  ;;  %v2424_v21 = vpop.permute.xlu2 %867 }
  0xdf   : > { %v1778_v34 = vpop.eup %1777 }
  0xe0   : > { %v1780_v33 = vpop.eup %1779  ;;  %899 = vmatpush.msra.mxu0 %v1778_v34 }
  0xe1   : > { %v1782_v55 = vpop.eup %1781  ;;  %964 = vmatpush.msra.mxu1 %v1780_v33 }
  0xe2   : > { %v1784_v35 = vpop.eup %1783  ;;  %1029 = vmatpush.msra.mxu2 %v1782_v55  ;;  %900 = vmatpush.msra.mxu0 %v1774_v31 }
  0xe3   : > { %v1786_v36 = vpop.eup %1785  ;;  %1094 = vmatpush.msra.mxu3 %v1784_v35  ;;  %965 = vmatpush.msra.mxu1 %v1776_v32  ;;  %v2450_v31 = vpop.permute.xlu0 %862 }
  0xe4   : > { %v1788_v38 = vpop.eup %1787  ;;  %1030 = vmatpush.msra.mxu2 %v1786_v36  ;;  %901 = vmatmul.f32.vlgmr.msra.gmra.mxu0 %v773_v63  ;;  %v2440_v53 = vpop.permute.xlu1 %857 }
  0xe5   : > { %1095 = vmatpush.msra.mxu3 %v1788_v38  ;;  %966 = vmatmul.f32.vlgmr.msra.gmra.mxu1 %v773_v63 }
  0xe6   : > { %1031 = vmatmul.f32.vlgmr.msra.gmra.mxu2 %v773_v63  ;;  %1096 = vmatmul.f32.vlgmr.msra.gmra.mxu3 %v773_v63  ;;  %v2438_v27 = vpop.permute.xlu2 %852 }
  0xeb   : > { %v2464_v36 = vpop.permute.xlu0 %847 }
  0xec   : > { %904 = vmatmul.f32.gmra.mxu0 %v774_v39  ;;  %v2462_v35 = vpop.permute.xlu1 %842 }
  0xed   : > { %969 = vmatmul.f32.gmra.mxu1 %v774_v39 }
  0xee   : > { %1034 = vmatmul.f32.gmra.mxu2 %v774_v39  ;;  %1099 = vmatmul.f32.gmra.mxu3 %v774_v39  ;;  %v2460_v63 = vpop.permute.xlu2 %837 }
  0xf4   : > { %907 = vmatmul.f32.gmra.mxu0 %v775_v40 }
  0xf5   : > { %972 = vmatmul.f32.gmra.mxu1 %v775_v40 }
  0xf6   : > { %1037 = vmatmul.f32.gmra.mxu2 %v775_v40  ;;  %1102 = vmatmul.f32.gmra.mxu3 %v775_v40 }
  0xfc   : > { %910 = vmatmul.f32.gmra.mxu0 %v776_v41 }
  0xfd   : > { %975 = vmatmul.f32.gmra.mxu1 %v776_v41 }
  0xfe   : > { %1040 = vmatmul.f32.gmra.mxu2 %v776_v41  ;;  %1105 = vmatmul.f32.gmra.mxu3 %v776_v41 }
 0x104   : > { %913 = vmatmul.f32.gmra.mxu0 %v777_v42 }
 0x105   : > { %978 = vmatmul.f32.gmra.mxu1 %v777_v42 }
 0x106   : > { %1043 = vmatmul.f32.gmra.mxu2 %v777_v42  ;;  %1108 = vmatmul.f32.gmra.mxu3 %v777_v42  ;;  %v2474_v42 = vpop.permute.xlu2 %822 }
 0x10c   : > { %916 = vmatmul.f32.gmra.mxu0 %v778_v43 }
 0x10d   : > { %981 = vmatmul.f32.gmra.mxu1 %v778_v43 }
 0x10e   : > { %1046 = vmatmul.f32.gmra.mxu2 %v778_v43  ;;  %1111 = vmatmul.f32.gmra.mxu3 %v778_v43  ;;  %v2476_v43 = vpop.permute.xlu1 %827 }
 0x114   : > { %919 = vmatmul.f32.gmra.mxu0 %v779_v44 }
 0x115   : > { %984 = vmatmul.f32.gmra.mxu1 %v779_v44 }
 0x116   : > { %1049 = vmatmul.f32.gmra.mxu2 %v779_v44  ;;  %1114 = vmatmul.f32.gmra.mxu3 %v779_v44  ;;  %v2478_v44 = vpop.permute.xlu0 %832 }
 0x11c   : > { %922 = vmatmul.f32.gmra.mxu0 %v780_v45 }
 0x11d   : > { %987 = vmatmul.f32.gmra.mxu1 %v780_v45 }
 0x11e   : > { %1052 = vmatmul.f32.gmra.mxu2 %v780_v45  ;;  %1117 = vmatmul.f32.gmra.mxu3 %v780_v45 }
 0x124   : > { %925 = vmatmul.f32.gmra.mxu0 %v781_v46 }
 0x125   : > { %990 = vmatmul.f32.gmra.mxu1 %v781_v46 }
 0x126   : > { %1055 = vmatmul.f32.gmra.mxu2 %v781_v46  ;;  %1120 = vmatmul.f32.gmra.mxu3 %v781_v46 }
 0x12c   : > { %928 = vmatmul.f32.gmra.mxu0 %v782_v47 }
 0x12d   : > { %993 = vmatmul.f32.gmra.mxu1 %v782_v47 }
 0x12e   : > { %1058 = vmatmul.f32.gmra.mxu2 %v782_v47  ;;  %1123 = vmatmul.f32.gmra.mxu3 %v782_v47 }
 0x134   : > { %931 = vmatmul.f32.gmra.mxu0 %v783_v48 }
 0x135   : > { %996 = vmatmul.f32.gmra.mxu1 %v783_v48 }
 0x136   : > { %1061 = vmatmul.f32.gmra.mxu2 %v783_v48  ;;  %1126 = vmatmul.f32.gmra.mxu3 %v783_v48 }
 0x13c   : > { %934 = vmatmul.f32.gmra.mxu0 %v784_v49 }
 0x13d   : > { %999 = vmatmul.f32.gmra.mxu1 %v784_v49 }
 0x13e   : > { %1064 = vmatmul.f32.gmra.mxu2 %v784_v49  ;;  %1129 = vmatmul.f32.gmra.mxu3 %v784_v49  ;;  %v2488_v49 = vpop.permute.xlu2 %807 }
 0x13f   : > { %2949 = vst [vmem:[#allocation11_spill] sm:$0xff] %v2488_v49 }
 0x144   : > { %937 = vmatmul.f32.gmra.mxu0 %v785_v50 }
 0x145   : > { %1002 = vmatmul.f32.gmra.mxu1 %v785_v50 }
 0x146   : > { %1067 = vmatmul.f32.gmra.mxu2 %v785_v50  ;;  %1132 = vmatmul.f32.gmra.mxu3 %v785_v50  ;;  %v2490_v50 = vpop.permute.xlu1 %812 }
 0x147   : > { %2950 = vst [vmem:[#allocation12_spill] sm:$0xff] %v2490_v50 }
 0x14c   : > { %940 = vmatmul.f32.gmra.mxu0 %v786_v51 }
 0x14d   : > { %1005 = vmatmul.f32.gmra.mxu1 %v786_v51 }
 0x14e   : > { %1070 = vmatmul.f32.gmra.mxu2 %v786_v51  ;;  %1135 = vmatmul.f32.gmra.mxu3 %v786_v51 }
 0x154   : > { %943 = vmatmul.f32.gmra.mxu0 %v787_v52 }
 0x155   : > { %1008 = vmatmul.f32.gmra.mxu1 %v787_v52 }
 0x156   : > { %1073 = vmatmul.f32.gmra.mxu2 %v787_v52  ;;  %1138 = vmatmul.f32.gmra.mxu3 %v787_v52 }
 0x15c   : > { %946 = vmatmul.f32.gmra.mxu0 %v788_v57 }
 0x15d   : > { %1011 = vmatmul.f32.gmra.mxu1 %v788_v57 }
 0x15e   : > { %1076 = vmatmul.f32.gmra.mxu2 %v788_v57  ;;  %1141 = vmatmul.f32.gmra.mxu3 %v788_v57 }
 0x161   : > { %v902_v58 = vpop.f32.mrf.mxu0 }
 0x162   : > { %v967_v56 = vpop.f32.mrf.mxu1  ;;  %v903_v51 = vadd.f32 %v902_v58, %v2488_v49 }
 0x163   : > { %v968_v52 = vadd.f32 %v967_v56, %v2488_v49 }
 0x164   : > { %1789 = vtanh.f32 %v903_v51 }
 0x165   : > { %1791 = vtanh.f32 %v968_v52 }
 0x169   : > { %v2376_v59 = vpop.f32.mrf.mxu2  ;;  %v2378_v60 = vpop.f32.mrf.mxu3 }
 0x16a   : > { %2943 = vst [vmem:[#allocation5_spill] sm:$0xff] %v2376_v59  ;;  %v905_v37 = vpop.f32.mrf.mxu0  ;;  %v2380_v61 = vpop.f32.mrf.mxu1 }
 0x16b   : > { %2944 = vst [vmem:[#allocation6_spill] sm:$0xff] %v2378_v60  ;;  %v906_v59 = vadd.f32 %v905_v37, %v2490_v50 }
 0x16d   : > { %1793 = vtanh.f32 %v906_v59  ;;  %v2523_v59 = vpop.eup %1789 }
 0x16e   : > { %2952 = vst [vmem:[#allocation14_spill] sm:$0xff] %v2523_v59 }
 0x171   : > { %v2382_v62 = vpop.f32.mrf.mxu2  ;;  %v2384_v0 = vpop.f32.mrf.mxu3 }
 0x172   : > { %2945 = vst [vmem:[#allocation7_spill] sm:$0xff] %v2382_v62  ;;  %v2386_v1 = vpop.f32.mrf.mxu0  ;;  %v2388_v2 = vpop.f32.mrf.mxu1 }
 0x173   : > { %2946 = vst [vmem:[#allocation8_spill] sm:$0xff] %v2384_v0 }
 0x179   : > { %v2390_v4 = vpop.f32.mrf.mxu2  ;;  %v2392_v5 = vpop.f32.mrf.mxu3 }
 0x17a   : > { %2947 = vst [vmem:[#allocation9_spill] sm:$0xff] %v2390_v4  ;;  %v2394_v6 = vpop.f32.mrf.mxu0  ;;  %v2396_v8 = vpop.f32.mrf.mxu1  ;;  %v971_v4 = vadd.f32 %v2380_v61, %v2490_v50 }
 0x17b   : > { %2948 = vst [vmem:[#allocation10_spill] sm:$0xff] %v2392_v5  ;;  %v2503_v5 = vpop.permute.xlu0 %817  ;;  %v912_v37 = vadd.f32 %v2394_v6, %v2474_v42  ;;  %v977_v49 = vadd.f32 %v2396_v8, %v2474_v42  ;;  %v2531_v8 = vpop.eup %1791 }
 0x17c   : > { %2951 = vst [vmem:[#allocation13_spill] sm:$0xff] %v2503_v5  ;;  %v909_v58 = vadd.f32 %v2386_v1, %v2503_v5  ;;  %v974_v56 = vadd.f32 %v2388_v2, %v2503_v5  ;;  %1795 = vtanh.f32 %v971_v4 }
 0x17d   : > { %2953 = vst [vmem:[#allocation15_spill] sm:$0xff] %v2531_v8 }
 0x17e   : > { %1797 = vtanh.f32 %v909_v58 }
 0x17f   : > { %1799 = vtanh.f32 %v974_v56 }
 0x180   : > { %1801 = vtanh.f32 %v912_v37 }
 0x181   : > { %v2398_v9 = vpop.f32.mrf.mxu2  ;;  %v2400_v10 = vpop.f32.mrf.mxu3  ;;  %1803 = vtanh.f32 %v977_v49 }
 0x182   : > { %v2402_v11 = vpop.f32.mrf.mxu0  ;;  %v2404_v12 = vpop.f32.mrf.mxu1 }
 0x183   : > { %v915_v61 = vadd.f32 %v2402_v11, %v2476_v43  ;;  %v980_v1 = vadd.f32 %v2404_v12, %v2476_v43  ;;  %v2535_v12 = vpop.eup %1793 }
 0x184   : > { %2954 = vst [vmem:[#allocation16_spill] sm:$0xff] %v2535_v12  ;;  %v2539_v56 = vpop.eup %1795 }
 0x185   : > { %1805 = vtanh.f32 %v915_v61  ;;  %2955 = vst [vmem:[#allocation17_spill] sm:$0xff] %v2539_v56  ;;  %v2543_v37 = vpop.eup %1797 }
 0x186   : > { %1807 = vtanh.f32 %v980_v1  ;;  %2956 = vst [vmem:[#allocation18_spill] sm:$0xff] %v2543_v37  ;;  %v2547_v8 = vpop.eup %1799 }
 0x187   : > { %2957 = vst [vmem:[#allocation19_spill] sm:$0xff] %v2547_v8  ;;  %v2551_v61 = vpop.eup %1801 }
 0x188   : > { %2958 = vst [vmem:[#allocation20_spill] sm:$0xff] %v2551_v61  ;;  %v2555_v1 = vpop.eup %1803 }
 0x189   : > { %v2406_v13 = vpop.f32.mrf.mxu2  ;;  %v2408_v3 = vpop.f32.mrf.mxu3  ;;  %2959 = vst [vmem:[#allocation21_spill] sm:$0xff] %v2555_v1 }
 0x18a   : > { %v2410_v14 = vpop.f32.mrf.mxu0  ;;  %v2412_v15 = vpop.f32.mrf.mxu1 }
 0x18b   : > { %v918_v2 = vadd.f32 %v2410_v14, %v2478_v44  ;;  %v983_v11 = vadd.f32 %v2412_v15, %v2478_v44 }
 0x18d   : > { %1809 = vtanh.f32 %v918_v2 }
 0x18e   : > { %1811 = vtanh.f32 %v983_v11  ;;  %v2563_v11 = vpop.eup %1805 }
 0x18f   : > { %2960 = vst [vmem:[#allocation22_spill] sm:$0xff] %v2563_v11  ;;  %v2567_v56 = vpop.eup %1807 }
 0x190   : > { %2961 = vst [vmem:[#allocation23_spill] sm:$0xff] %v2567_v56 }
 0x191   : > { %v2416_v17 = vpop.f32.mrf.mxu2  ;;  %v2418_v18 = vpop.f32.mrf.mxu3 }
 0x192   : > { %v2420_v19 = vpop.f32.mrf.mxu0  ;;  %v2422_v20 = vpop.f32.mrf.mxu1 }
 0x193   : > { %v921_v58 = vadd.f32 %v2420_v19, %v2460_v63  ;;  %v986_v14 = vadd.f32 %v2422_v20, %v2460_v63 }
 0x195   : > { %1813 = vtanh.f32 %v921_v58 }
 0x196   : > { %1815 = vtanh.f32 %v986_v14  ;;  %v2571_v14 = vpop.eup %1809 }
 0x197   : > { %v2575_v12 = vpop.eup %1811 }
 0x198   : > { %2962 = vst [vmem:[#allocation24_spill] sm:$0xff] %v2575_v12 }
 0x199   : > { %v2430_v24 = vpop.f32.mrf.mxu2  ;;  %v2432_v25 = vpop.f32.mrf.mxu3 }
 0x19a   : > { %v2434_v7 = vpop.f32.mrf.mxu0  ;;  %v2436_v26 = vpop.f32.mrf.mxu1 }
 0x19b   : > { %v924_v49 = vadd.f32 %v2434_v7, %v2462_v35  ;;  %v989_v15 = vadd.f32 %v2436_v26, %v2462_v35 }
 0x19d   : > { %1817 = vtanh.f32 %v924_v49  ;;  %v2579_v49 = vpop.eup %1813 }
 0x19e   : > { %1819 = vtanh.f32 %v989_v15  ;;  %v2583_v8 = vpop.eup %1815 }
 0x1a1   : > { %v2442_v28 = vpop.f32.mrf.mxu2  ;;  %v2444_v54 = vpop.f32.mrf.mxu3 }
 0x1a2   : > { %v2446_v29 = vpop.f32.mrf.mxu0  ;;  %v2448_v30 = vpop.f32.mrf.mxu1 }
 0x1a3   : > { %v927_v19 = vadd.f32 %v2446_v29, %v2464_v36  ;;  %v992_v20 = vadd.f32 %v2448_v30, %v2464_v36 }
 0x1a5   : > { %1821 = vtanh.f32 %v927_v19  ;;  %v2587_v19 = vpop.eup %1817 }
 0x1a6   : > { %1823 = vtanh.f32 %v992_v20  ;;  %v2591_v20 = vpop.eup %1819 }
 0x1a9   : > { %v2452_v32 = vpop.f32.mrf.mxu2  ;;  %v2454_v34 = vpop.f32.mrf.mxu3 }
 0x1aa   : > { %v2456_v33 = vpop.f32.mrf.mxu0  ;;  %v2458_v55 = vpop.f32.mrf.mxu1 }
 0x1ab   : > { %v930_v26 = vadd.f32 %v2456_v33, %v2438_v27  ;;  %v995_v29 = vadd.f32 %v2458_v55, %v2438_v27  ;;  %v2595_v37 = vpop.eup %1821 }
 0x1ad   : > { %1825 = vtanh.f32 %v930_v26 }
 0x1ae   : > { %1827 = vtanh.f32 %v995_v29 }
 0x1b1   : > { %v2466_v38 = vpop.f32.mrf.mxu2  ;;  %v2468_v39 = vpop.f32.mrf.mxu3 }
 0x1b2   : > { %v2470_v40 = vpop.f32.mrf.mxu0  ;;  %v2472_v41 = vpop.f32.mrf.mxu1 }
 0x1b3   : > { %v933_v30 = vadd.f32 %v2470_v40, %v2440_v53  ;;  %v998_v33 = vadd.f32 %v2472_v41, %v2440_v53 }
 0x1b5   : > { %1829 = vtanh.f32 %v933_v30 }
 0x1b6   : > { %1831 = vtanh.f32 %v998_v33 }
 0x1b9   : > { %v2480_v45 = vpop.f32.mrf.mxu2  ;;  %v2482_v46 = vpop.f32.mrf.mxu3 }
 0x1ba   : > { %v2484_v47 = vpop.f32.mrf.mxu0  ;;  %v2486_v48 = vpop.f32.mrf.mxu1 }
 0x1bb   : > { %v936_v15 = vadd.f32 %v2484_v47, %v2450_v31  ;;  %v1001_v55 = vadd.f32 %v2486_v48, %v2450_v31  ;;  %v2597_v48 = vpop.eup %1823 }
 0x1bc   : > { %v2601_v61 = vpop.eup %1825 }
 0x1bd   : > { %1833 = vtanh.f32 %v936_v15 }
 0x1be   : > { %1835 = vtanh.f32 %v1001_v55 }
 0x1c1   : > { %v2494_v57 = vpop.f32.mrf.mxu2  ;;  %v2496_v60 = vpop.f32.mrf.mxu3 }
 0x1c2   : > { %v2499_v0 = vpop.f32.mrf.mxu0  ;;  %v2501_v62 = vpop.f32.mrf.mxu1 }
 0x1c3   : > { %v939_v40 = vadd.f32 %v2499_v0, %v2424_v21  ;;  %v1004_v41 = vadd.f32 %v2501_v62, %v2424_v21  ;;  %v2604_v62 = vpop.eup %1827 }
 0x1c4   : > { %v2607_v15 = vpop.eup %1829 }
 0x1c5   : > { %1837 = vtanh.f32 %v939_v40  ;;  %v2611_v55 = vpop.eup %1831 }
 0x1c6   : > { %1839 = vtanh.f32 %v1004_v41  ;;  %v1834_v40 = vpop.eup %1833 }
 0x1c9   : > { %v2519_v51 = vpop.f32.mrf.mxu2  ;;  %v2521_v52 = vpop.f32.mrf.mxu3 }
 0x1ca   : > { %v2527_v4 = vpop.f32.mrf.mxu0  ;;  %v2529_v6 = vpop.f32.mrf.mxu1 }
 0x1cb   : > { %v942_v50 = vadd.f32 %v2527_v4, %v2426_v22 }
 0x1d1   : > { %v2559_v2 = vpop.f32.mrf.mxu2  ;;  %v2561_v7 = vpop.f32.mrf.mxu3 }
 0x1d2   : > { %v944_v58 = vpop.f32.mrf.mxu0  ;;  %v1009_v59 = vpop.f32.mrf.mxu1 }
 0x1d3   : > { %v945_v33 = vadd.f32 %v944_v58, %v2428_v23  ;;  %v1010_v56 = vadd.f32 %v1009_v59, %v2428_v23  ;;  %v1836_v58 = vpop.eup %1835 }
 0x1d4   : > { %v1838_v11 = vpop.eup %1837 }
 0x1d9   : > { %v1074_v26 = vpop.f32.mrf.mxu2  ;;  %v1139_v47 = vpop.f32.mrf.mxu3 }
 0x1da   : > { %v947_v29 = vpop.f32.mrf.mxu0  ;;  %v1012_v1 = vpop.f32.mrf.mxu1  ;;  %v1075_v59 = vadd.f32 %v1074_v26, %v2428_v23  ;;  %v1140_v5 = vadd.f32 %v1139_v47, %v2428_v23  ;;  %v1069_v26 = vadd.f32 %v2519_v51, %v2424_v21  ;;  %v1134_v23 = vadd.f32 %v2521_v52, %v2424_v21 }
 0x1db   : > { %v948_v30 = vadd.f32 %v947_v29, %v2414_v16  ;;  %v1013_v0 = vadd.f32 %v1012_v1, %v2414_v16  ;;  %v1007_v1 = vadd.f32 %v2529_v6, %v2426_v22  ;;  %v1063_v47 = vadd.f32 %v2480_v45, %v2440_v53 }
 0x1dc   : > { %v1128_v21 = vadd.f32 %v2482_v46, %v2440_v53  ;;  %v1060_v52 = vadd.f32 %v2466_v38, %v2438_v27  ;;  %v1057_v53 = vadd.f32 %v2452_v32, %v2464_v36  ;;  %v1122_v38 = vadd.f32 %v2454_v34, %v2464_v36 }
 0x1dd   : > { %1841 = vtanh.f32 %v948_v30  ;;  %v1840_v30 = vpop.eup %1839  ;;  %v1051_v36 = vadd.f32 %v2430_v24, %v2460_v63 }
 0x1de   : > { %1843 = vtanh.f32 %v1013_v0  ;;  %v1072_v0 = vadd.f32 %v2559_v2, %v2426_v22 }
 0x1df   : > { %1845 = vtanh.f32 %v945_v33  ;;  %v1137_v33 = vadd.f32 %v2561_v7, %v2426_v22  ;;  %v1131_v7 = vadd.f32 %v2496_v60, %v2450_v31 }
 0x1e0   : > { %1847 = vtanh.f32 %v1010_v56 }
 0x1e1   : > { %v1077_v29 = vpop.f32.mrf.mxu2  ;;  %v1142_v41 = vpop.f32.mrf.mxu3  ;;  %1849 = vtanh.f32 %v942_v50 }
 0x1e2   : > { %v1078_v12 = vadd.f32 %v1077_v29, %v2414_v16  ;;  %v1143_v4 = vadd.f32 %v1142_v41, %v2414_v16  ;;  %1851 = vtanh.f32 %v1007_v1  ;;  %v2971_v29 = vld [vmem:[#allocation8_spill] sm:$0xff] }
 0x1e3   : > { %v1842_v6 = vpop.eup %1841 }
 0x1e4   : > { %1853 = vtanh.f32 %v1078_v12  ;;  %v1844_v56 = vpop.eup %1843  ;;  %1216 = vmatpush.msrb.mxu0 %v1842_v6  ;;  %v1066_v12 = vadd.f32 %v2494_v57, %v2450_v31  ;;  %v1125_v31 = vadd.f32 %v2468_v39, %v2438_v27  ;;  %v1054_v27 = vadd.f32 %v2442_v28, %v2462_v35  ;;  %v2974_v6 = vld [vmem:[#allocation5_spill] sm:$0xff] }
 0x1e5   : > { %1855 = vtanh.f32 %v1143_v4  ;;  %v1846_v50 = vpop.eup %1845  ;;  %1236 = vmatpush.msrb.mxu1 %v1844_v56  ;;  %v1119_v39 = vadd.f32 %v2444_v54, %v2462_v35  ;;  %v1048_v35 = vadd.f32 %v2416_v17, %v2478_v44  ;;  %v2975_v56 = vld [vmem:[#allocation21_spill] sm:$0xff] }
 0x1e6   : > { %1857 = vtanh.f32 %v1075_v59  ;;  %v1848_v16 = vpop.eup %1847  ;;  %1217 = vmatpush.msrb.mxu0 %v1846_v50  ;;  %v2972_v59 = vld [vmem:[#allocation20_spill] sm:$0xff]  ;;  %v2976_v50 = vld [vmem:[#allocation6_spill] sm:$0xff] }
 0x1e7   : > { %1859 = vtanh.f32 %v1140_v5  ;;  %v1850_v2 = vpop.eup %1849  ;;  %1237 = vmatpush.msrb.mxu1 %v1848_v16  ;;  %v2977_v16 = vld [vmem:[#allocation18_spill] sm:$0xff] }
 0x1e8   : > { %1861 = vtanh.f32 %v1072_v0  ;;  %v1852_v22 = vpop.eup %1851  ;;  %1218 = vmatpush.msrb.mxu0 %v1850_v2  ;;  %v2978_v2 = vld [vmem:[#allocation19_spill] sm:$0xff] }
 0x1e9   : > { %1863 = vtanh.f32 %v1137_v33  ;;  %1238 = vmatpush.msrb.mxu1 %v1852_v22  ;;  %v2979_v22 = vld [vmem:[#allocation16_spill] sm:$0xff] }
 0x1ea   : > { %v1854_v51 = vpop.eup %1853  ;;  %1865 = vtanh.f32 %v1069_v26  ;;  %1219 = vmatpush.msrb.mxu0 %v1838_v11 }
 0x1eb   : > { %v1856_v5 = vpop.eup %1855  ;;  %1867 = vtanh.f32 %v1134_v23  ;;  %1256 = vmatpush.msrb.mxu2 %v1854_v51  ;;  %1239 = vmatpush.msrb.mxu1 %v1840_v30  ;;  %v2973_v30 = vld [vmem:[#allocation11_spill] sm:$0xff]  ;;  %v2980_v51 = vld [vmem:[#allocation17_spill] sm:$0xff] }
 0x1ec   : > { %v1858_v57 = vpop.eup %1857  ;;  %1869 = vtanh.f32 %v1066_v12  ;;  %1276 = vmatpush.msrb.mxu3 %v1856_v5  ;;  %1220 = vmatpush.msrb.mxu0 %v1834_v40  ;;  %v2970_v40 = vld [vmem:[#allocation23_spill] sm:$0xff]  ;;  %v1033_v0 = vadd.f32 %v2974_v6, %v2973_v30  ;;  %v1098_v26 = vadd.f32 %v2976_v50, %v2973_v30 }
 0x1ed   : > { %v1860_v60 = vpop.eup %1859  ;;  %1871 = vtanh.f32 %v1131_v7  ;;  %1257 = vmatpush.msrb.mxu2 %v1858_v57  ;;  %1240 = vmatpush.msrb.mxu1 %v1836_v58 }
 0x1ee   : > { %v1862_v45 = vpop.eup %1861  ;;  %1873 = vtanh.f32 %v1063_v47  ;;  %1277 = vmatpush.msrb.mxu3 %v1860_v60  ;;  %1221 = vmatpush.msrb.mxu0 %v2607_v15  ;;  %v1116_v15 = vadd.f32 %v2432_v25, %v2460_v63  ;;  %v1045_v63 = vadd.f32 %v2406_v13, %v2476_v43  ;;  %v1209_v47 = vld [vmem:[%s2933_s7] sm:$0xf] }
 0x1ef   : > { %v1864_v46 = vpop.eup %1863  ;;  %1875 = vtanh.f32 %v1128_v21  ;;  %1258 = vmatpush.msrb.mxu2 %v1862_v45  ;;  %1241 = vmatpush.msrb.mxu1 %v2611_v55  ;;  %v2967_v55 = vld [vmem:[#allocation22_spill] sm:$0xff] }
 0x1f0   : > { %v1866_v11 = vpop.eup %1865  ;;  %1877 = vtanh.f32 %v1060_v52  ;;  %1278 = vmatpush.msrb.mxu3 %v1864_v46  ;;  %1222 = vmatpush.msrb.mxu0 %v2601_v61  ;;  %v1113_v61 = vadd.f32 %v2418_v18, %v2478_v44  ;;  %v1042_v44 = vadd.f32 %v2398_v9, %v2474_v42  ;;  %v2981_v21 = vld [vmem:[#allocation14_spill] sm:$0xff]  ;;  %v2982_v52 = vld [vmem:[#allocation15_spill] sm:$0xff] }
 0x1f1   : > { %v1868_v32 = vpop.eup %1867  ;;  %1879 = vtanh.f32 %v1125_v31  ;;  %1259 = vmatpush.msrb.mxu2 %v1866_v11  ;;  %1242 = vmatpush.msrb.mxu1 %v2604_v62 }
 0x1f2   : > { %v1870_v34 = vpop.eup %1869  ;;  %1881 = vtanh.f32 %v1057_v53  ;;  %1279 = vmatpush.msrb.mxu3 %v1868_v32  ;;  %1223 = vmatpush.msrb.mxu0 %v2595_v37  ;;  %v1110_v37 = vadd.f32 %v2408_v3, %v2476_v43  ;;  %v2963_v43 = vld [vmem:[#allocation13_spill] sm:$0xff] }
 0x1f3   : > { %v1872_v28 = vpop.eup %1871  ;;  %1883 = vtanh.f32 %v1122_v38  ;;  %1260 = vmatpush.msrb.mxu2 %v1870_v34  ;;  %1243 = vmatpush.msrb.mxu1 %v2597_v48  ;;  %v2965_v48 = vld [vmem:[#allocation24_spill] sm:$0xff]  ;;  %v1949_v38 = vld [vmem:[%s2174_s29] sm:$0xf] }
 0x1f4   : > { %v1874_v54 = vpop.eup %1873  ;;  %1885 = vtanh.f32 %v1054_v27  ;;  %1280 = vmatpush.msrb.mxu3 %v1872_v28  ;;  %1224 = vmatpush.msrb.mxu0 %v2587_v19  ;;  %v1107_v19 = vadd.f32 %v2400_v10, %v2474_v42  ;;  %v2968_v42 = vld [vmem:[#allocation12_spill] sm:$0xff]  ;;  %v1304_v11 = vperm.slane %v1949_v38, 0  ;;  %v1400_v27 = vpop.permute.xlu1 %1399  ;;  %v1305_v32 = vperm.slane %v1949_v38, 1 }
 0x1f5   : > { %v1876_v24 = vpop.eup %1875  ;;  %1887 = vtanh.f32 %v1119_v39  ;;  %1261 = vmatpush.msrb.mxu2 %v1874_v54  ;;  %1244 = vmatpush.msrb.mxu1 %v2591_v20  ;;  %v1101_v41 = vadd.f32 %v2971_v29, %v2968_v42  ;;  %v1301_v39 = vpop.permute.xlu0 %1300 }
 0x1f6   : > { %v1878_v25 = vpop.eup %1877  ;;  %1889 = vtanh.f32 %v1051_v36  ;;  %1281 = vmatpush.msrb.mxu3 %v1876_v24  ;;  %1225 = vmatpush.msrb.mxu0 %v2579_v49  ;;  %v2964_v49 = vld [vmem:[#allocation9_spill] sm:$0xff]  ;;  %v1402_v34 = vsub.f32 %v1304_v11, %v1400_v27  ;;  %v1316_v36 = vstv %s1627_s20  ;;  %v1312_v28 = vsub.f32 %v1301_v39, %v1304_v11 }
 0x1f7   : > { %v1880_v17 = vpop.eup %1879  ;;  %1891 = vtanh.f32 %v1116_v15  ;;  %1262 = vmatpush.msrb.mxu2 %v1878_v25  ;;  %1245 = vmatpush.msrb.mxu1 %v2583_v8  ;;  %v1039_v20 = vadd.f32 %v2964_v49, %v2963_v43  ;;  %v2966_v8 = vld [vmem:[#allocation10_spill] sm:$0xff]  ;;  %v1403_v15 = vsub.f32 %v1305_v32, %v1400_v27  ;;  %v1313_v54 = vsub.f32 %v1301_v39, %v1305_v32 }
 0x1f8   : > { %v1882_v18 = vpop.eup %1881  ;;  %1893 = vtanh.f32 %v1048_v35  ;;  %1282 = vmatpush.msrb.mxu3 %v1880_v17  ;;  %1226 = vmatpush.msrb.mxu0 %v2571_v14  ;;  %v1104_v62 = vadd.f32 %v2966_v8, %v2963_v43  ;;  %v2969_v14 = vld [vmem:[#allocation7_spill] sm:$0xff]  ;;  %v1406_v35 = vmul.f32 %v1402_v34, %v1316_v36  ;;  %v1306_v24 = vperm.slane %v1949_v38, 2 }
 0x1f9   : > { %v1884_v13 = vpop.eup %1883  ;;  %1895 = vtanh.f32 %v1113_v61  ;;  %1263 = vmatpush.msrb.mxu2 %v1882_v18  ;;  %1246 = vmatpush.msrb.mxu1 %v2965_v48  ;;  %v1036_v1 = vadd.f32 %v2969_v14, %v2968_v42  ;;  %v1317_v61 = vmul.f32 %v1316_v36, %v1312_v28  ;;  %v1307_v25 = vperm.slane %v1949_v38, 3 }
 0x1fa   : > { %v1886_v3 = vpop.eup %1885  ;;  %1897 = vtanh.f32 %v1045_v63  ;;  %1283 = vmatpush.msrb.mxu3 %v1884_v13  ;;  %1227 = vmatpush.msrb.mxu0 %v2967_v55  ;;  %v1407_v63 = vmul.f32 %v1403_v15, %v1316_v36  ;;  %v1318_v17 = vmul.f32 %v1316_v36, %v1313_v54  ;;  %v1404_v18 = vsub.f32 %v1306_v24, %v1400_v27 }
 0x1fb   : > { %v1888_v9 = vpop.eup %1887  ;;  %1899 = vtanh.f32 %v1110_v37  ;;  %1264 = vmatpush.msrb.mxu2 %v1886_v3  ;;  %1247 = vmatpush.msrb.mxu1 %v2970_v40  ;;  %v1632_v37 = vmul.f32 -1.442695, %v1406_v35  ;;  %v1405_v13 = vsub.f32 %v1307_v25, %v1400_v27  ;;  %v1314_v3 = vsub.f32 %v1301_v39, %v1306_v24 }
 0x1fc   : > { %v1890_v10 = vpop.eup %1889  ;;  %1901 = vtanh.f32 %v1042_v44  ;;  %1284 = vmatpush.msrb.mxu3 %v1888_v9  ;;  %1228 = vmatpush.msrb.mxu0 %v2972_v59  ;;  %v1628_v44 = vmul.f32 -1.442695, %v1317_v61  ;;  %v1629_v43 = vmul.f32 -1.442695, %v1318_v17  ;;  %v1315_v49 = vsub.f32 %v1301_v39, %v1307_v25 }
 0x1fd   : > { %v1892_v58 = vpop.eup %1891  ;;  %1903 = vtanh.f32 %v1107_v19  ;;  %1265 = vmatpush.msrb.mxu2 %v1890_v10  ;;  %1248 = vmatpush.msrb.mxu1 %v2975_v56  ;;  %v1633_v19 = vmul.f32 -1.442695, %v1407_v63  ;;  %v1409_v48 = vmul.f32 %v1405_v13, %v1316_v36  ;;  %v1319_v9 = vmul.f32 %v1316_v36, %v1314_v3 }
 0x1fe   : > { %v1894_v4 = vpop.eup %1893  ;;  %1905 = vtanh.f32 %v1039_v20  ;;  %1285 = vmatpush.msrb.mxu3 %v1892_v58  ;;  %1229 = vmatpush.msrb.mxu0 %v2977_v16  ;;  %v1408_v20 = vmul.f32 %v1404_v18, %v1316_v36  ;;  %v1320_v8 = vmul.f32 %v1316_v36, %v1315_v49 }
 0x1ff   : > { %v1896_v33 = vpop.eup %1895  ;;  %1907 = vtanh.f32 %v1104_v62  ;;  %1266 = vmatpush.msrb.mxu2 %v1894_v4  ;;  %1249 = vmatpush.msrb.mxu1 %v2978_v2  ;;  %v1635_v10 = vmul.f32 -1.442695, %v1409_v48  ;;  %v1630_v14 = vmul.f32 -1.442695, %v1319_v9 }
 0x200   : > { %v1898_v23 = vpop.eup %1897  ;;  %1909 = vtanh.f32 %v1036_v1  ;;  %1286 = vmatpush.msrb.mxu3 %v1896_v33  ;;  %1230 = vmatpush.msrb.mxu0 %v2979_v22  ;;  %v1634_v62 = vmul.f32 -1.442695, %v1408_v20  ;;  %v1631_v40 = vmul.f32 -1.442695, %v1320_v8 }
 0x201   : > { %v1900_v12 = vpop.eup %1899  ;;  %1911 = vtanh.f32 %v1101_v41  ;;  %1267 = vmatpush.msrb.mxu2 %v1898_v23  ;;  %1250 = vmatpush.msrb.mxu1 %v2980_v51 }
 0x202   : > { %v1902_v7 = vpop.eup %1901  ;;  %1913 = vtanh.f32 %v1033_v0  ;;  %1287 = vmatpush.msrb.mxu3 %v1900_v12  ;;  %1231 = vmatpush.msrb.mxu0 %v2981_v21 }
 0x203   : > { %v1904_v5 = vpop.eup %1903  ;;  %1915 = vtanh.f32 %v1098_v26  ;;  %1268 = vmatpush.msrb.mxu2 %v1902_v7  ;;  %1251 = vmatpush.msrb.mxu1 %v2982_v52  ;;  %v1486_v52 = vlaneseq }
 0x204   : > { %v1906_v57 = vpop.eup %1905  ;;  %1288 = vmatpush.msrb.mxu3 %v1904_v5  ;;  %1232 = vmatmul.f32.vlgmr.msrb.gmra.mxu0 %v1209_v47  ;;  %1917 = vpow2.f32 %v1632_v37 }
 0x205   : > { %v1908_v60 = vpop.eup %1907  ;;  %1252 = vmatmul.f32.vlgmr.msrb.gmra.mxu1 %v1209_v47  ;;  %1269 = vmatpush.msrb.mxu2 %v1906_v57  ;;  %1919 = vpow2.f32 %v1628_v44  ;;  %v2751_v32 = vshrl.u32 %v1486_v52, 7 }
 0x206   : > { %v1910_v31 = vpop.eup %1909  ;;  %1289 = vmatpush.msrb.mxu3 %v1908_v60  ;;  %1921 = vpow2.f32 %v1633_v19 }
 0x207   : > { %v1912_v45 = vpop.eup %1911  ;;  %1270 = vmatpush.msrb.mxu2 %v1910_v31  ;;  %1923 = vpow2.f32 %v1629_v43 }
 0x208   : > { %v1914_v53 = vpop.eup %1913  ;;  %1290 = vmatpush.msrb.mxu3 %v1912_v45  ;;  %1925 = vpow2.f32 %v1634_v62 }
 0x209   : > { %v1916_v46 = vpop.eup %1915  ;;  %1271 = vmatpush.msrb.mxu2 %v1914_v53  ;;  %1927 = vpow2.f32 %v1635_v10 }
 0x20a   : > { %1291 = vmatpush.msrb.mxu3 %v1916_v46  ;;  %1272 = vmatmul.f32.vlgmr.msrb.gmra.mxu2 %v1209_v47  ;;  %v1918_v55 = vpop.eup %1917  ;;  %1929 = vpow2.f32 %v1630_v14 }
 0x20b   : > { %1292 = vmatmul.f32.vlgmr.msrb.gmra.mxu3 %v1209_v47  ;;  %v1920_v42 = vpop.eup %1919  ;;  %v2701_v29 = vadd.f32 1.0, %v1918_v55  ;;  %1931 = vpow2.f32 %v1631_v40 }
 0x20c   : > { %v1922_v1 = vpop.eup %1921  ;;  %v2703_v41 = vadd.f32 1.0, %v1920_v42 }
 0x20d   : > { %v1924_v58 = vpop.eup %1923  ;;  %v2705_v59 = vadd.f32 1.0, %v1922_v1  ;;  %1933 = vrcp.f32 %v2701_v29  ;;  %v1435_v60 = vand.u32 2147483647, %v2701_v29  ;;  %vm1431_vm0 = vweird.f32 %v2701_v29 }
 0x20e   : > { %v2707_v4 = vadd.f32 1.0, %v1924_v58  ;;  %1935 = vrcp.f32 %v2703_v41  ;;  %v1926_v30 = vpop.eup %1925  ;;  %v1437_v27 = vand.u32 2147483648, %v2701_v29  ;;  %vm1342_vm3 = vweird.f32 %v2703_v41 }
 0x20f   : > { %1937 = vrcp.f32 %v2705_v59  ;;  %v1928_v6 = vpop.eup %1927  ;;  %v2719_v16 = vadd.f32 1.0, %v1926_v30  ;;  %vm2755_vm1 = vcmp.eq.f32.partialorder %v1435_v60, 8.507059e+37  ;;  %vm1446_vm2 = vweird.f32 %v2705_v59 }
 0x210   : > { %1939 = vrcp.f32 %v2707_v4  ;;  %v1930_v0 = vpop.eup %1929  ;;  %v2723_v2 = vadd.f32 1.0, %v1928_v6  ;;  %v1346_v54 = vand.u32 2147483647, %v2703_v41  ;;  %v1348_v61 = vand.u32 2147483648, %v2703_v41 }
 0x211   : > { %v1932_v56 = vpop.eup %1931  ;;  %v2725_v12 = vadd.f32 1.0, %v1930_v0  ;;  %1941 = vrcp.f32 %v2719_v16  ;;  %v1363_v63 = vand.u32 2147483648, %v2707_v4  ;;  %v1438_v43 = vor.u32 1.1754944e-38, %v1437_v27 }
 0x212   : > { %v2731_v51 = vadd.f32 1.0, %v1932_v56  ;;  %1943 = vrcp.f32 %v2723_v2  ;;  %v1450_v49 = vand.u32 2147483647, %v2705_v59  ;;  %v1452_v20 = vand.u32 2147483648, %v2705_v59 }
 0x213   : > { %v2713_v33 = vpop.eup %1933  ;;  %1945 = vrcp.f32 %v2725_v12  ;;  %vm1357_vm10 = vweird.f32 %v2707_v4  ;;  %v1361_v62 = vand.u32 2147483647, %v2707_v4  ;;  %vm1347_vm12 = vcmp.eq.f32.partialorder %v1346_v54, 8.507059e+37 }
 0x214   : > { %v2715_v50 = vpop.eup %1935  ;;  %v1427_v7 = vmul.f32 %v2713_v33, %v2701_v29  ;;  %1947 = vrcp.f32 %v2731_v51  ;;  %vm1432_vm4 = vweird.f32 %v2713_v33  ;;  %v1349_v10 = vor.u32 1.1754944e-38, %v1348_v61 }
 0x215   : > { %v2717_v26 = vpop.eup %1937  ;;  %v1338_v22 = vmul.f32 %v2715_v50, %v2703_v41  ;;  %vm1343_vm5 = vweird.f32 %v2715_v50  ;;  %vm2780_vm8 = vmor %vm1431_vm0, %vm1432_vm4  ;;  %v1364_v14 = vor.u32 1.1754944e-38, %v1363_v63  ;;  %v1453_v30 = vor.u32 1.1754944e-38, %v1452_v20 }
 0x216   : > { %v2721_v23 = vpop.eup %1939  ;;  %v1442_v5 = vmul.f32 %v2717_v26, %v2705_v59  ;;  %v1428_v57 = vsub.f32 1.0, %v1427_v7  ;;  %vm1447_vm7 = vweird.f32 %v2717_v26  ;;  %vm2792_vm9 = vmor %vm1342_vm3, %vm1343_vm5  ;;  %vm1362_vm14 = vcmp.eq.f32.partialorder %v1361_v62, 8.507059e+37 }
 0x217   : > { %v1353_v47 = vmul.f32 %v2721_v23, %v2707_v4  ;;  %v1339_v21 = vsub.f32 1.0, %v1338_v22  ;;  %v2742_v53 = vpop.eup %1941  ;;  %vm1358_vm6 = vweird.f32 %v2721_v23  ;;  %vm2810_vm11 = vmor %vm1446_vm2, %vm1447_vm7  ;;  %vm1451_vm15 = vcmp.eq.f32.partialorder %v1450_v49, 8.507059e+37 }
 0x218   : > { %v1443_v45 = vsub.f32 1.0, %v1442_v5  ;;  %v1429_v38 = vmul.f32 %v2713_v33, %v1428_v57  ;;  %v2746_v11 = vpop.eup %1943  ;;  %v1457_v35 = vmul.f32 %v2742_v53, %v2719_v16  ;;  %vm2816_vm13 = vmor %vm1357_vm10, %vm1358_vm6  ;;  %v1376_v0 = vand.u32 2147483647, %v2725_v12 }
 0x219   : > { %v1354_v31 = vsub.f32 1.0, %v1353_v47  ;;  %v1340_v46 = vmul.f32 %v2715_v50, %v1339_v21  ;;  %v2753_v39 = vpop.eup %1945  ;;  %v1472_v19 = vmul.f32 %v2746_v11, %v2723_v2  ;;  %v1378_v56 = vand.u32 2147483648, %v2725_v12 }
 0x21a   : > { %v1444_v28 = vmul.f32 %v2717_v26, %v1443_v45  ;;  %v2762_v15 = vpop.eup %1947  ;;  %v1430_v25 = vadd.f32 %v2713_v33, %v1429_v38  ;;  %v1368_v17 = vmul.f32 %v2753_v39, %v2725_v12  ;;  %v1458_v48 = vsub.f32 1.0, %v1457_v35  ;;  %v1214_v35 = vpop.permute.xlu2 %1213 }
 0x21b   : > { %v1355_v36 = vmul.f32 %v2721_v23, %v1354_v31  ;;  %v1341_v24 = vadd.f32 %v2715_v50, %v1340_v46  ;;  %v1383_v13 = vmul.f32 %v2762_v15, %v2731_v51  ;;  %v1473_v41 = vsub.f32 1.0, %v1472_v19 }
 0x21c   : > { %v1445_v44 = vadd.f32 %v2717_v26, %v1444_v28  ;;  %v1434_v8 = vsel %vm2780_vm8, %v2713_v33, %v1430_v25  ;;  %v1369_v1 = vsub.f32 1.0, %v1368_v17  ;;  %v1459_v6 = vmul.f32 %v2742_v53, %v1458_v48 }
 0x21d   : > { %v1356_v18 = vadd.f32 %v2721_v23, %v1355_v36  ;;  %v1345_v9 = vsel %vm2792_vm9, %v2715_v50, %v1341_v24  ;;  %v1384_v29 = vsub.f32 1.0, %v1383_v13  ;;  %v1439_v4 = vsel %vm2755_vm1, %v1438_v43, %v1434_v8 }
 0x21e   : > { %v1449_v58 = vsel %vm2810_vm11, %v2717_v26, %v1445_v44  ;;  %v1350_v59 = vsel %vm1347_vm12, %v1349_v10, %v1345_v9  ;;  %vm1489_vm0 = vcmp.eq.s32.totalorder %v2751_v32, 3  ;;  %v1474_v7 = vmul.f32 %v2746_v11, %v1473_v41 }
 0x21f   : > { %v1360_v40 = vsel %vm2816_vm13, %v2721_v23, %v1356_v18  ;;  %v1454_v50 = vsel %vm1451_vm15, %v1453_v30, %v1449_v58  ;;  %v1370_v23 = vmul.f32 %v2753_v39, %v1369_v1  ;;  %v1490_v26 = vmul.f32 %v1439_v4, %v1350_v59 }
 0x220   : > { %v1365_v33 = vsel %vm1362_vm14, %v1364_v14, %v1360_v40  ;;  %v1385_v22 = vmul.f32 %v2762_v15, %v1384_v29  ;;  %vm1488_vm1 = vcmp.eq.s32.totalorder %v2751_v32, 0  ;;  %vm1372_vm2 = vweird.f32 %v2725_v12 }
 0x221   : > { %v1460_v47 = vadd.f32 %v2742_v53, %v1459_v6  ;;  %vm1462_vm3 = vweird.f32 %v2742_v53  ;;  %v1491_v5 = vmul.f32 %v1454_v50, %v1365_v33  ;;  %vm1373_vm4 = vweird.f32 %v2753_v39 }
 0x222   : > { %vm2840_vm5 = vcmp.eq.f32.partialorder %v1376_v0, 8.507059e+37  ;;  %v1379_v57 = vor.u32 1.1754944e-38, %v1378_v56  ;;  %vm1461_vm6 = vweird.f32 %v2719_v16  ;;  %v1371_v60 = vadd.f32 %v2753_v39, %v1370_v23  ;;  %vm2860_vm10 = vmor %vm1372_vm2, %vm1373_vm4 }
 0x223   : > { %v1465_v31 = vand.u32 2147483647, %v2719_v16  ;;  %v1467_v45 = vand.u32 2147483648, %v2719_v16  ;;  %vm1388_vm7 = vweird.f32 %v2762_v15  ;;  %v1496_v46 = vsel %vm1489_vm0, %v1439_v4, %v1490_v26  ;;  %vm2851_vm8 = vmor %vm1461_vm6, %vm1462_vm3 }
 0x224   : > { %v1386_v27 = vadd.f32 %v2762_v15, %v1385_v22  ;;  %v1475_v34 = vadd.f32 %v2746_v11, %v1474_v7  ;;  %vm1477_vm9 = vweird.f32 %v2746_v11  ;;  %v1464_v16 = vsel %vm2851_vm8, %v2742_v53, %v1460_v47 }
 0x225   : > { %vm1387_vm11 = vweird.f32 %v2731_v51  ;;  %v1393_v28 = vand.u32 2147483648, %v2731_v51  ;;  %v1482_v54 = vand.u32 2147483648, %v2723_v2  ;;  %v1497_v24 = vsel %vm1489_vm0, %v1454_v50, %v1491_v5 }
 0x226   : > { %vm2872_vm12 = vmor %vm1387_vm11, %vm1388_vm7  ;;  %v1391_v61 = vand.u32 2147483647, %v2731_v51  ;;  %vm1476_vm13 = vweird.f32 %v2723_v2  ;;  %v1480_v53 = vand.u32 2147483647, %v2723_v2  ;;  %v1502_v63 = vsel %vm1488_vm1, %v1350_v59, %v1496_v46 }
 0x227   : > { %v1375_v37 = vsel %vm2860_vm10, %v2753_v39, %v1371_v60  ;;  %vm2884_vm14 = vcmp.eq.f32.partialorder %v1465_v31, 8.507059e+37  ;;  %v1468_v44 = vor.u32 1.1754944e-38, %v1467_v45  ;;  %vm2890_vm15 = vmor %vm1476_vm13, %vm1477_vm9  ;;  %v1390_v19 = vsel %vm2872_vm12, %v2762_v15, %v1386_v27 }
 0x228   : > { %v1479_v39 = vsel %vm2890_vm15, %v2746_v11, %v1475_v34  ;;  %vm1510_vm2 = vcmask 1043456   ;;  %v1503_v3 = vsel %vm1488_vm1, %v1365_v33, %v1497_v24  ;;  %v1394_v43 = vor.u32 1.1754944e-38, %v1393_v28 }
 0x229   : > { %v1483_v49 = vor.u32 1.1754944e-38, %v1482_v54  ;;  %vm1392_vm3 = vcmp.eq.f32.partialorder %v1391_v61, 8.507059e+37  ;;  %vm1481_vm4 = vcmp.eq.f32.partialorder %v1480_v53, 8.507059e+37  ;;  %v1380_v9 = vsel %vm2840_vm5, %v1379_v57, %v1375_v37 }
 0x22a   : > { %v1469_v15 = vsel %vm2884_vm14, %v1468_v44, %v1464_v16  ;;  %v1395_v8 = vsel %vm1392_vm3, %v1394_v43, %v1390_v19  ;;  %vm1550_vm5 = vcmask 1041408   ;;  %vm1555_vm6 = vcmp.lt.s32.totalorder %v1486_v52, 512 }
 0x22b   : > { %v1484_v62 = vsel %vm1481_vm4, %v1483_v49, %v1479_v39  ;;  %v1492_v42 = vmul.f32 %v1469_v15, %v1380_v9 }
 0x22c   : > { %v1493_v14 = vmul.f32 %v1484_v62, %v1395_v8 }
 0x22d   : > { %v1498_v58 = vsel %vm1489_vm0, %v1469_v15, %v1492_v42 }
 0x22e   : > { %v1499_v29 = vsel %vm1489_vm0, %v1484_v62, %v1493_v14  ;;  %v1504_v56 = vsel %vm1488_vm1, %v1380_v9, %v1498_v58  ;;  %vm1546_vm0 = vcmask 1040384  }
 0x22f   : > { %v1505_v33 = vsel %vm1488_vm1, %v1395_v8, %v1499_v29  ;;  %vm1548_vm1 = vcmask 1042434  }
 0x281   : > { %v1233_v25 = vpop.f32.mrf.mxu0 }
 0x282   : > { %v1253_v17 = vpop.f32.mrf.mxu1  ;;  %v1234_v2 = vadd.f32 %v1233_v25, %v1214_v35 }
 0x283   : > { %v1254_v13 = vadd.f32 %v1253_v17, %v1214_v35 }
 0x284   : > { %v1506_v20 = vmul.f32 %v1502_v63, %v1234_v2 }
 0x285   : > { %v1507_v48 = vmul.f32 %v1503_v3, %v1254_v13 }
 0x286   : > { %v1511_v10 = vsel %vm1510_vm2, %v1506_v20, 0.0 }
 0x287   : > { %v1518_v11 = vsel %vm1510_vm2, %v1507_v48, 0.0  ;;  %v1512_v40 = vrot.slane %v1511_v10, 4 }
 0x288   : > { %v1519_v55 = vrot.slane %v1518_v11, 4 }
 0x289   : > { %v1513_v0 = vadd.f32 %v1512_v40, %v1511_v10 }
 0x28a   : > { %v1520_v1 = vadd.f32 %v1519_v55, %v1518_v11 }
 0x28b   : > { %v1514_v47 = vrot.slane %v1513_v0, 2 }
 0x28c   : > { %v1521_v41 = vrot.slane %v1520_v1, 2 }
 0x28d   : > { %v1273_v59 = vpop.f32.mrf.mxu2  ;;  %v1515_v45 = vadd.f32 %v1514_v47, %v1513_v0 }
 0x28e   : > { %v1293_v4 = vpop.f32.mrf.mxu3  ;;  %v1274_v30 = vadd.f32 %v1273_v59, %v1214_v35  ;;  %v1522_v26 = vadd.f32 %v1521_v41, %v1520_v1 }
 0x28f   : > { %v1294_v6 = vadd.f32 %v1293_v4, %v1214_v35  ;;  %v1516_v36 = vrot.slane %v1515_v45, 1 }
 0x290   : > { %v1508_v50 = vmul.f32 %v1504_v56, %v1274_v30  ;;  %v1523_v57 = vrot.slane %v1522_v26, 1 }
 0x291   : > { %v1509_v23 = vmul.f32 %v1505_v33, %v1294_v6  ;;  %v1517_v12 = vadd.f32 %v1516_v36, %v1515_v45 }
 0x292   : > { %v1525_v22 = vsel %vm1510_vm2, %v1508_v50, 0.0  ;;  %v1524_v27 = vadd.f32 %v1523_v57, %v1522_v26 }
 0x293   : > { %v1532_v7 = vsel %vm1510_vm2, %v1509_v23, 0.0  ;;  %v1526_v5 = vrot.slane %v1525_v22, 4 }
 0x294   : > { %v1533_v21 = vrot.slane %v1532_v7, 4  ;;  %v1543_v54 = vrot.slane %v1524_v27, 7 }
 0x295   : > { %v1527_v60 = vadd.f32 %v1526_v5, %v1525_v22 }
 0x296   : > { %v1534_v31 = vadd.f32 %v1533_v21, %v1532_v7  ;;  %v1547_v25 = vsel %vm1546_vm0, %v1517_v12, %v1543_v54 }
 0x297   : > { %v1528_v46 = vrot.slane %v1527_v60, 2 }
 0x298   : > { %v1535_v38 = vrot.slane %v1534_v31, 2 }
 0x299   : > { %v1529_v32 = vadd.f32 %v1528_v46, %v1527_v60 }
 0x29a   : > { %v1536_v34 = vadd.f32 %v1535_v38, %v1534_v31 }
 0x29b   : > { %v1530_v16 = vrot.slane %v1529_v32, 1 }
 0x29c   : > { %v1537_v28 = vrot.slane %v1536_v34, 1 }
 0x29d   : > { %v1531_v35 = vadd.f32 %v1530_v16, %v1529_v32 }
 0x29e   : > { %v1538_v24 = vadd.f32 %v1537_v28, %v1536_v34 }
 0x29f   : > { %v1544_v61 = vrot.slane %v1531_v35, 6 }
 0x2a0   : > { %v1545_v53 = vrot.slane %v1538_v24, 5 }
 0x2a2   : > { %v1549_v63 = vsel %vm1548_vm1, %v1544_v61, %v1545_v53 }
 0x2a3   : > { %v1551_v17 = vsel %vm1550_vm5, %v1547_v25, %v1549_v63 }
 0x2a4   : > { %1557 = vst.msk [vmem:[%s370_s22] sm:$0xf] %vm1555_vm6, %v1551_v17 }
 0x2a5 PF: > { %s21_s13 = sadd.s32 1, %s1975_s13  }
 0x2a6   : > { %p18_p7 = scmp.ge.s32.totalorder %s21_s13, 4  }
 0x2a8   :  { %20 = sbr.rel (!%p18_p7) target bundleno = 1 (0x1), region = 95 }
 0x2ad   :  { %1578 = vsyncpa [#allocation3], 1 }
 0x2ae   :  { %1580 = vsyncpa [#allocation3 + $0x1], 1 }

</bundles_post_ra>
